<compile_context>
chip_gen: v7x
topology: tpu7x:2x2x1
jax: 0.10.0
libtpu: 0.0.40
codegen_flags: <defaults>
</compile_context>

<pallas_src>
import math
import jax
import jax.numpy as jnp
from jax import lax
from jax.experimental import pallas as pl
from jax.experimental.pallas import tpu as pltpu


def _round_up(x, m):
    return ((x + m - 1) // m) * m


def _vae_kernel(x_ref, eps_ref,
                w1_ref, b1_ref,
                wh_ref, bh_ref,
                w3_ref, b3_ref,
                w4_ref, b4_ref,
                recon_ref, head_ref):
    lp = eps_ref.shape[-1]                       # padded latent width (128)

    x = x_ref[...]                               # [Bt, D_p] f32

    # fc1: h1 = relu(x @ W1 + b1)   (bf16 weight promoted to f32, f32 accumulate)
    w1 = w1_ref[...].astype(jnp.float32)
    h1 = jnp.dot(x, w1, preferred_element_type=jnp.float32) + b1_ref[...]
    h1 = jnp.maximum(h1, 0.0)

    # fused fc21|fc22 head: one lane-dense [Bt, 2*lp] matmul
    wh = wh_ref[...].astype(jnp.float32)
    head = jnp.dot(h1, wh, preferred_element_type=jnp.float32) + bh_ref[...]
    head_ref[...] = head                         # mu in [:, :latent], logvar in [:, lp:lp+latent]

    mu_pad = head[:, :lp]                        # 128-aligned static slices
    logvar_pad = head[:, lp:]

    # reparameterize: z = mu + eps * exp(0.5 * logvar)
    # (eps is zero in padded lanes -> z is exactly zero there)
    z = mu_pad + eps_ref[...] * jnp.exp(0.5 * logvar_pad)

    # fc3: h3 = relu(z @ W3 + b3)   (K padded 2 -> 128, zero rows are exact)
    w3 = w3_ref[...].astype(jnp.float32)
    h3 = jnp.dot(z, w3, preferred_element_type=jnp.float32) + b3_ref[...]
    h3 = jnp.maximum(h3, 0.0)

    # fc4 + sigmoid
    w4 = w4_ref[...].astype(jnp.float32)
    logits = jnp.dot(h3, w4, preferred_element_type=jnp.float32) + b4_ref[...]
    recon_ref[...] = jax.nn.sigmoid(logits)


def init_params(key, in_dim, hidden=400, latent=2):
    """nn.Linear-style init U(-1/sqrt(fan_in), 1/sqrt(fan_in)); weights as [in, out]."""
    def linear(k, fan_in, fan_out):
        kw, kb = jax.random.split(k)
        bound = 1.0 / math.sqrt(fan_in)
        w = jax.random.uniform(kw, (fan_in, fan_out), jnp.float32, -bound, bound)
        b = jax.random.uniform(kb, (1, fan_out), jnp.float32, -bound, bound)
        return w, b

    k1, k2, k3, k4, k5 = jax.random.split(key, 5)
    w1, b1 = linear(k1, in_dim, hidden)      # fc1
    w21, b21 = linear(k2, hidden, latent)    # fc21
    w22, b22 = linear(k3, hidden, latent)    # fc22
    w3, b3 = linear(k4, latent, hidden)      # fc3
    w4, b4 = linear(k5, hidden, in_dim)      # fc4
    return (w1, b1, w21, b21, w22, b22, w3, b3, w4, b4)


def prepare_params(params, in_dim, hidden=400, latent=2):
    """Fuse fc21|fc22, zero-pad all dims to lane/tile multiples, cast weights to bf16."""
    (w1, b1, w21, b21, w22, b22, w3, b3, w4, b4) = params
    D_p = _round_up(in_dim, 128)
    H_p = _round_up(hidden, 128)          # 400 -> 512
    LP = _round_up(latent, 128)           # 2   -> 128

    w1_p = jnp.zeros((D_p, H_p), jnp.float32).at[:in_dim, :hidden].set(w1)
    b1_p = jnp.zeros((1, H_p), jnp.float32).at[:, :hidden].set(b1)

    wh_p = (jnp.zeros((H_p, 2 * LP), jnp.float32)
            .at[:hidden, :latent].set(w21)
            .at[:hidden, LP:LP + latent].set(w22))
    bh_p = (jnp.zeros((1, 2 * LP), jnp.float32)
            .at[:, :latent].set(b21)
            .at[:, LP:LP + latent].set(b22))

    w3_p = jnp.zeros((LP, H_p), jnp.float32).at[:latent, :hidden].set(w3)
    b3_p = jnp.zeros((1, H_p), jnp.float32).at[:, :hidden].set(b3)

    w4_p = jnp.zeros((H_p, D_p), jnp.float32).at[:hidden, :in_dim].set(w4)
    b4_p = jnp.zeros((1, D_p), jnp.float32).at[:, :in_dim].set(b4)

    # bf16 weights in HBM (halves dominant DMA traffic); biases stay f32.
    return (w1_p.astype(jnp.bfloat16), b1_p,
            wh_p.astype(jnp.bfloat16), bh_p,
            w3_p.astype(jnp.bfloat16), b3_p,
            w4_p.astype(jnp.bfloat16), b4_p)


def vae_forward(x_nchw, prep_params, eps, *, latent=2):
    """x_nchw: [B, C, H, W] f32; eps: [B, latent] f32.
    Returns (recon [B, D], mu [B, latent], logvar [B, latent])."""
    B = x_nchw.shape[0]
    D = math.prod(x_nchw.shape[1:])
    (w1, b1, wh, bh, w3, b3, w4, b4) = prep_params
    D_p, H_p = w1.shape
    LP = wh.shape[1] // 2

    # Batch tiling: pad B to the tile size; tile is a multiple of 8 (sublane) and
    # capped at 256 (full MXU occupancy on v7x; more than enough on v5e/v6e).
    Bt = min(_round_up(B, 8), 256)
    B_p = _round_up(B, Bt)

    x_flat = x_nchw.reshape(B, D).astype(jnp.float32)
    x_p = jnp.zeros((B_p, D_p), jnp.float32).at[:B, :D].set(x_flat)
    eps_p = jnp.zeros((B_p, LP), jnp.float32).at[:B, :latent].set(eps)

    tile_map = lambda i: (i, 0)
    const_map = lambda i: (0, 0)

    # Advisory cost estimate (overhead-dominated kernel; lets XLA schedule around it).
    flops = 2 * B_p * (D_p * H_p + H_p * 2 * LP + LP * H_p + H_p * D_p)
    transcendentals = B_p * (D_p + LP)
    weight_bytes = sum(int(p.size) * p.dtype.itemsize for p in prep_params)
    io_bytes = (int(x_p.size) + int(eps_p.size) + B_p * D_p + B_p * 2 * LP) * 4
    cost = pl.CostEstimate(flops=flops, transcendentals=transcendentals,
                           bytes_accessed=weight_bytes + io_bytes)

    # Explicit VMEM budget: resident weights + double-buffered activation tiles + margin,
    # capped well below v7x's 64 MiB physical VMEM.
    tile_bytes = 4 * Bt * (D_p + LP + D_p + 2 * LP)
    vmem_limit = min(weight_bytes + 4 * tile_bytes + (8 << 20), 48 << 20)

    recon_p, head = pl.pallas_call(
        _vae_kernel,
        grid=(B_p // Bt,),
        in_specs=[
            pl.BlockSpec((Bt, D_p), tile_map),     # x
            pl.BlockSpec((Bt, LP), tile_map),      # eps
            pl.BlockSpec(w1.shape, const_map),
            pl.BlockSpec(b1.shape, const_map),
            pl.BlockSpec(wh.shape, const_map),
            pl.BlockSpec(bh.shape, const_map),
            pl.BlockSpec(w3.shape, const_map),
            pl.BlockSpec(b3.shape, const_map),
            pl.BlockSpec(w4.shape, const_map),
            pl.BlockSpec(b4.shape, const_map),
        ],
        out_specs=(
            pl.BlockSpec((Bt, D_p), tile_map),       # recon (padded)
            pl.BlockSpec((Bt, 2 * LP), tile_map),    # fused mu|logvar head
        ),
        out_shape=(
            jax.ShapeDtypeStruct((B_p, D_p), jnp.float32),
            jax.ShapeDtypeStruct((B_p, 2 * LP), jnp.float32),
        ),
        compiler_params=pltpu.CompilerParams(
            dimension_semantics=("parallel",),
            vmem_limit_bytes=int(vmem_limit),
        ),
        cost_estimate=cost,
    )(x_p, eps_p, w1, b1, wh, bh, w3, b3, w4, b4)

    recon = recon_p[:B, :D]
    mu = head[:B, :latent]
    logvar = head[:B, LP:LP + latent]
    return recon, mu, logvar


def vae_reference(x_nchw, prep_params, eps, *, latent=2):
    """Pure-JAX reference using the SAME padded/bf16-quantized weights."""
    B = x_nchw.shape[0]
    D = math.prod(x_nchw.shape[1:])
    (w1, b1, wh, bh, w3, b3, w4, b4) = prep_params
    D_p, H_p = w1.shape
    LP = wh.shape[1] // 2
    hp = jax.lax.Precision.HIGHEST

    x = jnp.zeros((B, D_p), jnp.float32).at[:, :D].set(x_nchw.reshape(B, D))
    eps_p = jnp.zeros((B, LP), jnp.float32).at[:, :latent].set(eps)

    w1f, whf, w3f, w4f = (w.astype(jnp.float32) for w in (w1, wh, w3, w4))
    h1 = jax.nn.relu(jnp.dot(x, w1f, precision=hp) + b1)
    head = jnp.dot(h1, whf, precision=hp) + bh
    mu_pad, logvar_pad = head[:, :LP], head[:, LP:]
    z = mu_pad + eps_p * jnp.exp(0.5 * logvar_pad)
    h3 = jax.nn.relu(jnp.dot(z, w3f, precision=hp) + b3)
    recon = jax.nn.sigmoid(jnp.dot(h3, w4f, precision=hp) + b4)
    return recon[:, :D], head[:, :latent], head[:, LP:LP + latent]


if __name__ == "__main__":
    # shape = (C, H, W) = (1, 16, 16)  ->  D = 256
    shape = (1, 16, 16)
    B = 2
    D = math.prod(shape)
    latent = 2
    hidden = 400

    key = jax.random.PRNGKey(0)
    kx, keps, kparams = jax.random.split(key, 3)

    x = jax.random.normal(kx, (B,) + shape, dtype=jnp.float32)
    # eps ~ N(0,1): generated host-side (deterministic) and passed into the kernel,
    # standing in for torch.randn_like in reparameterize.
    eps = jax.random.normal(keps, (B, latent), dtype=jnp.float32)

    params = init_params(kparams, D, hidden=hidden, latent=latent)
    prep = prepare_params(params, D, hidden=hidden, latent=latent)

    recon, mu, logvar = vae_forward(x, prep, eps, latent=latent)
    jax.block_until_ready((recon, mu, logvar))

    # sanity check against pure-JAX reference (same bf16-quantized, padded weights)
    r_ref, mu_ref, lv_ref = vae_reference(x, prep, eps, latent=latent)
    assert recon.shape == (B, D) and mu.shape == (B, latent) and logvar.shape == (B, latent)
    assert jnp.allclose(recon, r_ref, atol=1e-3, rtol=1e-3)
    assert jnp.allclose(mu, mu_ref, atol=1e-3, rtol=1e-3)
    assert jnp.allclose(logvar, lv_ref, atol=1e-3, rtol=1e-3)

    print("KERNEL_OK")
</pallas_src>

<mosaic_0001>
module attributes {stable_mosaic.version = 11 : i64} {
  func.func @_vae_kernel(%arg0: i32, %arg1: memref<8x256xf32, #tpu.memory_space<vmem>>, %arg2: memref<8x128xf32, #tpu.memory_space<vmem>>, %arg3: memref<256x512xbf16, #tpu.memory_space<vmem>>, %arg4: memref<1x512xf32, #tpu.memory_space<vmem>>, %arg5: memref<512x256xbf16, #tpu.memory_space<vmem>>, %arg6: memref<1x256xf32, #tpu.memory_space<vmem>>, %arg7: memref<128x512xbf16, #tpu.memory_space<vmem>>, %arg8: memref<1x512xf32, #tpu.memory_space<vmem>>, %arg9: memref<512x256xbf16, #tpu.memory_space<vmem>>, %arg10: memref<1x256xf32, #tpu.memory_space<vmem>>, %arg11: memref<8x256xf32, #tpu.memory_space<vmem>>, %arg12: memref<8x256xf32, #tpu.memory_space<vmem>>) attributes {dimension_semantics = [#tpu.dimension_semantics<parallel>], iteration_bounds = array<i64: 1>, scalar_prefetch = 0 : i64, scratch_operands = 0 : i64, tpu.core_type = #tpu.core_type<tc>, window_params = [{transform_indices = @transform_0, window_bounds = array<i64: 8, 256>}, {transform_indices = @transform_1, window_bounds = array<i64: 8, 128>}, {pipeline_mode = #tpu.pipeline_mode<synchronous>, transform_indices = @transform_2, window_bounds = array<i64: 256, 512>}, {pipeline_mode = #tpu.pipeline_mode<synchronous>, transform_indices = @transform_3, window_bounds = array<i64: 1, 512>}, {pipeline_mode = #tpu.pipeline_mode<synchronous>, transform_indices = @transform_4, window_bounds = array<i64: 512, 256>}, {pipeline_mode = #tpu.pipeline_mode<synchronous>, transform_indices = @transform_5, window_bounds = array<i64: 1, 256>}, {pipeline_mode = #tpu.pipeline_mode<synchronous>, transform_indices = @transform_6, window_bounds = array<i64: 128, 512>}, {pipeline_mode = #tpu.pipeline_mode<synchronous>, transform_indices = @transform_7, window_bounds = array<i64: 1, 512>}, {pipeline_mode = #tpu.pipeline_mode<synchronous>, transform_indices = @transform_8, window_bounds = array<i64: 512, 256>}, {pipeline_mode = #tpu.pipeline_mode<synchronous>, transform_indices = @transform_9, window_bounds = array<i64: 1, 256>}, {transform_indices = @transform_10, window_bounds = array<i64: 8, 256>}, {transform_indices = @transform_11, window_bounds = array<i64: 8, 256>}]} {
    %c0 = arith.constant 0 : index
    %c0_0 = arith.constant 0 : index
    %0 = vector.load %arg1[%c0, %c0_0] : memref<8x256xf32, #tpu.memory_space<vmem>>, vector<8x256xf32>
    %c0_1 = arith.constant 0 : index
    %c0_2 = arith.constant 0 : index
    %1 = vector.load %arg3[%c0_1, %c0_2] : memref<256x512xbf16, #tpu.memory_space<vmem>>, vector<256x512xbf16>
    %2 = arith.extf %1 : vector<256x512xbf16> to vector<256x512xf32>
    %cst = arith.constant dense<0.000000e+00> : vector<8x512xf32>
    %3 = tpu.matmul %0, %2, %cst {dimension_numbers = #tpu.dot_dimension_numbers<[1], [0], [0], [1], [0, 0, 1, 1], [], []>} : vector<8x256xf32>, vector<256x512xf32>, vector<8x512xf32> -> vector<8x512xf32>
    %c0_3 = arith.constant 0 : index
    %c0_4 = arith.constant 0 : index
    %4 = vector.load %arg4[%c0_3, %c0_4] : memref<1x512xf32, #tpu.memory_space<vmem>>, vector<1x512xf32>
    %5 = vector.broadcast %4 : vector<1x512xf32> to vector<8x512xf32>
    %6 = arith.addf %3, %5 : vector<8x512xf32>
    %cst_5 = arith.constant 0.000000e+00 : f32
    %7 = vector.broadcast %cst_5 : f32 to vector<8x512xf32>
    %8 = arith.maximumf %6, %7 : vector<8x512xf32>
    %c0_6 = arith.constant 0 : index
    %c0_7 = arith.constant 0 : index
    %9 = vector.load %arg5[%c0_6, %c0_7] : memref<512x256xbf16, #tpu.memory_space<vmem>>, vector<512x256xbf16>
    %10 = arith.extf %9 : vector<512x256xbf16> to vector<512x256xf32>
    %cst_8 = arith.constant dense<0.000000e+00> : vector<8x256xf32>
    %11 = tpu.matmul %8, %10, %cst_8 {dimension_numbers = #tpu.dot_dimension_numbers<[1], [0], [0], [1], [0, 0, 1, 1], [], []>} : vector<8x512xf32>, vector<512x256xf32>, vector<8x256xf32> -> vector<8x256xf32>
    %c0_9 = arith.constant 0 : index
    %c0_10 = arith.constant 0 : index
    %12 = vector.load %arg6[%c0_9, %c0_10] : memref<1x256xf32, #tpu.memory_space<vmem>>, vector<1x256xf32>
    %13 = vector.broadcast %12 : vector<1x256xf32> to vector<8x256xf32>
    %14 = arith.addf %11, %13 : vector<8x256xf32>
    %c0_11 = arith.constant 0 : index
    %c0_12 = arith.constant 0 : index
    %15 = vector.load %arg12[%c0_11, %c0_12] : memref<8x256xf32, #tpu.memory_space<vmem>>, vector<8x256xf32>
    tpu.vector_store %arg12[%c0_11, %c0_12], %14 {strides = array<i32>} : memref<8x256xf32, #tpu.memory_space<vmem>>, vector<8x256xf32>,
    %16 = vector.extract_strided_slice %14 {offsets = [0, 0], sizes = [8, 128], strides = [1, 1]} : vector<8x256xf32> to vector<8x128xf32>
    %17 = vector.extract_strided_slice %14 {offsets = [0, 128], sizes = [8, 128], strides = [1, 1]} : vector<8x256xf32> to vector<8x128xf32>
    %c0_13 = arith.constant 0 : index
    %c0_14 = arith.constant 0 : index
    %18 = vector.load %arg2[%c0_13, %c0_14] : memref<8x128xf32, #tpu.memory_space<vmem>>, vector<8x128xf32>
    %cst_15 = arith.constant 5.000000e-01 : f32
    %19 = vector.broadcast %cst_15 : f32 to vector<8x128xf32>
    %20 = arith.mulf %19, %17 : vector<8x128xf32>
    %21 = math.exp %20 : vector<8x128xf32>
    %22 = arith.mulf %18, %21 : vector<8x128xf32>
    %23 = arith.addf %16, %22 : vector<8x128xf32>
    %c0_16 = arith.constant 0 : index
    %c0_17 = arith.constant 0 : index
    %24 = vector.load %arg7[%c0_16, %c0_17] : memref<128x512xbf16, #tpu.memory_space<vmem>>, vector<128x512xbf16>
    %25 = arith.extf %24 : vector<128x512xbf16> to vector<128x512xf32>
    %cst_18 = arith.constant dense<0.000000e+00> : vector<8x512xf32>
    %26 = tpu.matmul %23, %25, %cst_18 {dimension_numbers = #tpu.dot_dimension_numbers<[1], [0], [0], [1], [0, 0, 1, 1], [], []>} : vector<8x128xf32>, vector<128x512xf32>, vector<8x512xf32> -> vector<8x512xf32>
    %c0_19 = arith.constant 0 : index
    %c0_20 = arith.constant 0 : index
    %27 = vector.load %arg8[%c0_19, %c0_20] : memref<1x512xf32, #tpu.memory_space<vmem>>, vector<1x512xf32>
    %28 = vector.broadcast %27 : vector<1x512xf32> to vector<8x512xf32>
    %29 = arith.addf %26, %28 : vector<8x512xf32>
    %cst_21 = arith.constant 0.000000e+00 : f32
    %30 = vector.broadcast %cst_21 : f32 to vector<8x512xf32>
    %31 = arith.maximumf %29, %30 : vector<8x512xf32>
    %c0_22 = arith.constant 0 : index
    %c0_23 = arith.constant 0 : index
    %32 = vector.load %arg9[%c0_22, %c0_23] : memref<512x256xbf16, #tpu.memory_space<vmem>>, vector<512x256xbf16>
    %33 = arith.extf %32 : vector<512x256xbf16> to vector<512x256xf32>
    %cst_24 = arith.constant dense<0.000000e+00> : vector<8x256xf32>
    %34 = tpu.matmul %31, %33, %cst_24 {dimension_numbers = #tpu.dot_dimension_numbers<[1], [0], [0], [1], [0, 0, 1, 1], [], []>} : vector<8x512xf32>, vector<512x256xf32>, vector<8x256xf32> -> vector<8x256xf32>
    %c0_25 = arith.constant 0 : index
    %c0_26 = arith.constant 0 : index
    %35 = vector.load %arg10[%c0_25, %c0_26] : memref<1x256xf32, #tpu.memory_space<vmem>>, vector<1x256xf32>
    %36 = vector.broadcast %35 : vector<1x256xf32> to vector<8x256xf32>
    %37 = arith.addf %34, %36 : vector<8x256xf32>
    %38 = arith.negf %37 : vector<8x256xf32>
    %39 = math.exp %38 : vector<8x256xf32>
    %cst_27 = arith.constant 1.000000e+00 : f32
    %40 = vector.broadcast %cst_27 : f32 to vector<8x256xf32>
    %41 = arith.addf %40, %39 : vector<8x256xf32>
    %42 = arith.divf %40, %41 : vector<8x256xf32>
    %c0_28 = arith.constant 0 : index
    %c0_29 = arith.constant 0 : index
    %43 = vector.load %arg11[%c0_28, %c0_29] : memref<8x256xf32, #tpu.memory_space<vmem>>, vector<8x256xf32>
    tpu.vector_store %arg11[%c0_28, %c0_29], %42 {strides = array<i32>} : memref<8x256xf32, #tpu.memory_space<vmem>>, vector<8x256xf32>,
    return
  }
  func.func @transform_0(%arg0: i32) -> (i32, i32) {
    %c0_i32 = arith.constant 0 : i32
    %c0_i32_0 = arith.constant 0 : i32
    return %arg0, %c0_i32 : i32, i32
  }
  func.func @transform_1(%arg0: i32) -> (i32, i32) {
    %c0_i32 = arith.constant 0 : i32
    %c0_i32_0 = arith.constant 0 : i32
    return %arg0, %c0_i32 : i32, i32
  }
  func.func @transform_2(%arg0: i32) -> (i32, i32) {
    %c0_i32 = arith.constant 0 : i32
    %c0_i32_0 = arith.constant 0 : i32
    %c0_i32_1 = arith.constant 0 : i32
    return %c0_i32, %c0_i32_0 : i32, i32
  }
  func.func @transform_3(%arg0: i32) -> (i32, i32) {
    %c0_i32 = arith.constant 0 : i32
    %c0_i32_0 = arith.constant 0 : i32
    %c0_i32_1 = arith.constant 0 : i32
    return %c0_i32, %c0_i32_0 : i32, i32
  }
  func.func @transform_4(%arg0: i32) -> (i32, i32) {
    %c0_i32 = arith.constant 0 : i32
    %c0_i32_0 = arith.constant 0 : i32
    %c0_i32_1 = arith.constant 0 : i32
    return %c0_i32, %c0_i32_0 : i32, i32
  }
  func.func @transform_5(%arg0: i32) -> (i32, i32) {
    %c0_i32 = arith.constant 0 : i32
    %c0_i32_0 = arith.constant 0 : i32
    %c0_i32_1 = arith.constant 0 : i32
    return %c0_i32, %c0_i32_0 : i32, i32
  }
  func.func @transform_6(%arg0: i32) -> (i32, i32) {
    %c0_i32 = arith.constant 0 : i32
    %c0_i32_0 = arith.constant 0 : i32
    %c0_i32_1 = arith.constant 0 : i32
    return %c0_i32, %c0_i32_0 : i32, i32
  }
  func.func @transform_7(%arg0: i32) -> (i32, i32) {
    %c0_i32 = arith.constant 0 : i32
    %c0_i32_0 = arith.constant 0 : i32
    %c0_i32_1 = arith.constant 0 : i32
    return %c0_i32, %c0_i32_0 : i32, i32
  }
  func.func @transform_8(%arg0: i32) -> (i32, i32) {
    %c0_i32 = arith.constant 0 : i32
    %c0_i32_0 = arith.constant 0 : i32
    %c0_i32_1 = arith.constant 0 : i32
    return %c0_i32, %c0_i32_0 : i32, i32
  }
  func.func @transform_9(%arg0: i32) -> (i32, i32) {
    %c0_i32 = arith.constant 0 : i32
    %c0_i32_0 = arith.constant 0 : i32
    %c0_i32_1 = arith.constant 0 : i32
    return %c0_i32, %c0_i32_0 : i32, i32
  }
  func.func @transform_10(%arg0: i32) -> (i32, i32) {
    %c0_i32 = arith.constant 0 : i32
    %c0_i32_0 = arith.constant 0 : i32
    return %arg0, %c0_i32 : i32, i32
  }
  func.func @transform_11(%arg0: i32) -> (i32, i32) {
    %c0_i32 = arith.constant 0 : i32
    %c0_i32_0 = arith.constant 0 : i32
    return %arg0, %c0_i32 : i32, i32
  }
}

</mosaic_0001>

<bundles_post_ra>
// kernel: tpu_custom_call.1
= control target key start
LH: loop header
LB: loop body
LE: loop exit
PB: predicated region body
PF: predicated region fallthrough
CT: control target
= control target key end

     0   :  { %17 = vsyncpa [#allocation3], 0  ;;  %s2967_s0 = inlined_call_operand.hbm [shape: f32[8,256], index: 0, kind: input, shape index: {}]   ;;  %s2968_s1 = inlined_call_operand.hbm [shape: f32[8,128], index: 1, kind: input, shape index: {}]   ;;  %s2969_s2 = inlined_call_operand.hbm [shape: bf16[256,512], index: 2, kind: input, shape index: {}]   ;;  %s2970_s3 = inlined_call_operand.vmem [shape: f32[1,512], index: 3, kind: input, shape index: {}]   ;;  %s2971_s4 = inlined_call_operand.hbm [shape: bf16[512,256], index: 4, kind: input, shape index: {}]   ;;  %s2972_s5 = inlined_call_operand.vmem [shape: f32[1,256], index: 5, kind: input, shape index: {}]   ;;  %s2973_s6 = inlined_call_operand.hbm [shape: bf16[128,512], index: 6, kind: input, shape index: {}]   ;;  %s2974_s7 = inlined_call_operand.vmem [shape: f32[1,512], index: 7, kind: input, shape index: {}]   ;;  %s2975_s8 = inlined_call_operand.hbm [shape: bf16[512,256], index: 8, kind: input, shape index: {}]   ;;  %s2976_s9 = inlined_call_operand.vmem [shape: f32[1,256], index: 9, kind: input, shape index: {}]   ;;  %s2977_s10 = inlined_call_operand.hbm [shape: f32[8,256], index: 10, kind: output, shape index: {0}]   ;;  %s2978_s11 = inlined_call_operand.hbm [shape: f32[8,256], index: 11, kind: output, shape index: {1}]  }
   0x1   :  { %18 = vsyncpa [#allocation6], 0 }
   0x2   :  { %19 = vsyncpa [#allocation9], 0 }
   0x3   :  { %20 = vsyncpa [#allocation12], 0 }
   0x4   :  { %21 = vsyncpa [#allocation4], 0 }
   0x5   :  { %22 = vsyncpa [#allocation15], 0  ;;  %s2718_s17 = smov [#allocation5]   ;;  %s2719_s19 = smov [#allocation8]  }
   0x6   :  { %s39_s18 = sshll.u32 %s2718_s17, 4  ;;  %s62_s20 = sshll.u32 %s2719_s19, 4  ;;  %s40_s18 = int_to_ptr.vmem [resolvable:$true] %s39_s18  ;;  %s2791_s20 = int_to_ptr.vmem [resolvable:$true] %s62_s20 }
   0x7   :  { %s2530_s23 = scalar_lea.hbm %s2968_s1, 128 }
   0x8   :  { %p2531_p0 = scmp.ne.s32.totalorder %s2968_s1, %s2530_s23  ;;  %p2534_p1 = scmp.lt.u32.totalorder %s2530_s23, %s2968_s1 }
   0xa   :  { %p2536_p2 = pnand %p2534_p1, %p2531_p0 }
   0xc   :  { %2539 = shalt.err (!%p2536_p2)
}
   0xd   :  { %s2540_s28 = scalar_lea.vmem %s40_s18, 128  ;;  %p2545_p4 = scmp.lt.s32.totalorder %s40_s18, %s40_s18 }
   0xe   :  { %p2541_p3 = scmp.ne.s32.totalorder %s40_s18, %s2540_s28  ;;  %p2546_p5 = scmp.lt.s32.totalorder %s2540_s28, %s2540_s28 }
  0x10   :  { %p2547_p6 = por %p2546_p5, %p2545_p4 }
  0x12   :  { %p2548_p7 = pnand %p2547_p6, %p2541_p3 }
  0x14   :  { %2551 = shalt.err (!%p2548_p7)
}
  0x15   :  { %42 = dma.hbm_to_vmem [thread:$0]  %s2968_s1, 128, %s40_s18, [#allocation6]  }
  0x16   :  { %s2552_s14 = scalar_lea.hbm %s2971_s4, 8192 }
  0x17   :  { %p2553_p8 = scmp.ne.s32.totalorder %s2971_s4, %s2552_s14  ;;  %p2556_p9 = scmp.lt.u32.totalorder %s2552_s14, %s2971_s4 }
  0x19   :  { %p2558_p10 = pnand %p2556_p9, %p2553_p8 }
  0x1b   :  { %2561 = shalt.err (!%p2558_p10)
}
  0x1c   :  { %s2562_s21 = scalar_lea.vmem %s2791_s20, 8192  ;;  %p2567_p12 = scmp.lt.s32.totalorder %s2791_s20, %s2791_s20 }
  0x1d   :  { %p2563_p11 = scmp.ne.s32.totalorder %s2791_s20, %s2562_s21  ;;  %p2568_p13 = scmp.lt.s32.totalorder %s2562_s21, %s2562_s21 }
  0x1f   :  { %p2569_p0 = por %p2568_p13, %p2567_p12 }
  0x21   :  { %p2570_p1 = pnand %p2569_p0, %p2563_p11 }
  0x23   :  { %2573 = shalt.err (!%p2570_p1)
}
  0x24   :  { %s2720_s1 = smov 128   ;;  %s2721_s18 = smov 8  }
  0x25   :  { %68 = dma.hbm_to_vmem [thread:$0]  %s2971_s4, 8192, %s2791_s20, [#allocation9], %s2720_s1, %s2720_s1, %s2721_s18  }
  0x26   :  { %s2722_s24 = smov [#allocation2]   ;;  %s2723_s26 = smov [#allocation7]  }
  0x27   :  { %s29_s25 = sshll.u32 %s2722_s24, 4  ;;  %s48_s27 = sshll.u32 %s2723_s26, 4  ;;  %s30_s25 = int_to_ptr.vmem [resolvable:$true] %s29_s25  ;;  %s2825_s27 = int_to_ptr.vmem [resolvable:$true] %s48_s27 }
  0x28   :  { %s2574_s30 = scalar_lea.hbm %s2967_s0, 256 }
  0x29   :  { %p2575_p2 = scmp.ne.s32.totalorder %s2967_s0, %s2574_s30  ;;  %p2578_p3 = scmp.lt.u32.totalorder %s2574_s30, %s2967_s0 }
  0x2b   :  { %p2580_p4 = pnand %p2578_p3, %p2575_p2 }
  0x2d   :  { %2583 = shalt.err (!%p2580_p4)
}
  0x2e   :  { %s2584_s4 = scalar_lea.vmem %s30_s25, 256  ;;  %p2589_p6 = scmp.lt.s32.totalorder %s30_s25, %s30_s25 }
  0x2f   :  { %p2585_p5 = scmp.ne.s32.totalorder %s30_s25, %s2584_s4  ;;  %p2590_p7 = scmp.lt.s32.totalorder %s2584_s4, %s2584_s4 }
  0x31   :  { %p2591_p8 = por %p2590_p7, %p2589_p6 }
  0x33   :  { %p2592_p9 = pnand %p2591_p8, %p2585_p5 }
  0x35   :  { %2595 = shalt.err (!%p2592_p9)
}
  0x36   :  { %32 = dma.hbm_to_vmem [thread:$0]  %s2967_s0, 256, %s30_s25, [#allocation3]  }
  0x37   :  { %s2596_s21 = scalar_lea.hbm %s2969_s2, 8192 }
  0x38   :  { %p2597_p10 = scmp.ne.s32.totalorder %s2969_s2, %s2596_s21  ;;  %p2600_p11 = scmp.lt.u32.totalorder %s2596_s21, %s2969_s2 }
  0x3a   :  { %p2602_p12 = pnand %p2600_p11, %p2597_p10 }
  0x3c   :  { %2605 = shalt.err (!%p2602_p12)
}
  0x3d   :  { %s2606_s28 = scalar_lea.vmem %s2825_s27, 8192  ;;  %p2611_p0 = scmp.lt.s32.totalorder %s2825_s27, %s2825_s27 }
  0x3e   :  { %p2607_p13 = scmp.ne.s32.totalorder %s2825_s27, %s2606_s28  ;;  %p2612_p1 = scmp.lt.s32.totalorder %s2606_s28, %s2606_s28 }
  0x40   :  { %p2613_p2 = por %p2612_p1, %p2611_p0 }
  0x42   :  { %p2614_p3 = pnand %p2613_p2, %p2607_p13 }
  0x44   :  { %2617 = shalt.err (!%p2614_p3)
}
  0x45   :  { %s2724_s0 = smov 256   ;;  %s2725_s25 = smov 16  }
  0x46   :  { %54 = dma.hbm_to_vmem [thread:$0]  %s2969_s2, 8192, %s2825_s27, [#allocation6], %s2724_s0, %s2724_s0, %s2725_s25  }
  0x47   :  { %s2726_s12 = smov [#allocation10]   ;;  %s2727_s14 = smov [#allocation11]  }
  0x48   :  { %s76_s13 = sshll.u32 %s2726_s12, 4  ;;  %s90_s15 = sshll.u32 %s2727_s14, 4  ;;  %s77_s13 = int_to_ptr.vmem [resolvable:$true] %s76_s13  ;;  %s2856_s15 = int_to_ptr.vmem [resolvable:$true] %s90_s15 }
  0x49   :  { %s2618_s16 = scalar_lea.hbm %s2973_s6, 4096 }
  0x4a   :  { %p2619_p4 = scmp.ne.s32.totalorder %s2973_s6, %s2618_s16  ;;  %p2622_p5 = scmp.lt.u32.totalorder %s2618_s16, %s2973_s6 }
  0x4c   :  { %p2624_p6 = pnand %p2622_p5, %p2619_p4 }
  0x4e   :  { %2627 = shalt.err (!%p2624_p6)
}
  0x4f   :  { %s2628_s2 = scalar_lea.vmem %s77_s13, 4096  ;;  %p2633_p8 = scmp.lt.s32.totalorder %s77_s13, %s77_s13 }
  0x50   :  { %p2629_p7 = scmp.ne.s32.totalorder %s77_s13, %s2628_s2  ;;  %p2634_p9 = scmp.lt.s32.totalorder %s2628_s2, %s2628_s2 }
  0x52   :  { %p2635_p10 = por %p2634_p9, %p2633_p8 }
  0x54   :  { %p2636_p11 = pnand %p2635_p10, %p2629_p7 }
  0x56   :  { %2639 = shalt.err (!%p2636_p11)
}
  0x57   :  { %82 = dma.hbm_to_vmem [thread:$0]  %s2973_s6, 4096, %s77_s13, [#allocation9], %s2724_s0, %s2724_s0, %s2725_s25  }
  0x58   :  { %s2640_s28 = scalar_lea.hbm %s2975_s8, 8192 }
  0x59   :  { %p2641_p12 = scmp.ne.s32.totalorder %s2975_s8, %s2640_s28  ;;  %p2644_p13 = scmp.lt.u32.totalorder %s2640_s28, %s2975_s8 }
  0x5b   :  { %p2646_p0 = pnand %p2644_p13, %p2641_p12 }
  0x5d   :  { %2649 = shalt.err (!%p2646_p0)
}
  0x5e   :  { %s2650_s4 = scalar_lea.vmem %s2856_s15, 8192  ;;  %p2655_p2 = scmp.lt.s32.totalorder %s2856_s15, %s2856_s15 }
  0x5f   :  { %p2651_p1 = scmp.ne.s32.totalorder %s2856_s15, %s2650_s4  ;;  %p2656_p3 = scmp.lt.s32.totalorder %s2650_s4, %s2650_s4 }
  0x61   :  { %p2657_p4 = por %p2656_p3, %p2655_p2 }
  0x63   :  { %p2658_p5 = pnand %p2657_p4, %p2651_p1 }
  0x65   :  { %2661 = shalt.err (!%p2658_p5)
}
  0x66   :  { %96 = dma.hbm_to_vmem [thread:$0]  %s2975_s8, 8192, %s2856_s15, [#allocation12], %s2720_s1, %s2720_s1, %s2721_s18  }
  0x67   :  { %2706 = dma.done.wait [#allocation3], 256  }
  0x68   :  { %2707 = vsyncadd [#allocation3], 4294967040 }
  0x69   :  { %2708 = dma.done.wait [#allocation6], 8320  }
  0x6a   :  { %2709 = vsyncadd [#allocation6], 4294958976 }
  0x6b   :  { %2710 = dma.done.wait [#allocation9], 12288  }
  0x6c   :  { %2711 = vsyncadd [#allocation9], 4294955008 }
  0x6d   :  { %2712 = dma.done.wait [#allocation12], 8192  }
  0x6e   :  { %2713 = vsyncadd [#allocation12], 4294959104  ;;  %v2184_v0 = vld [vmem:[#allocation7 + $0x4] ss:$16 sps:$4 sm:$0xff]   ;;  %v2186_v1 = vld [vmem:[#allocation7] ss:$16 sps:$4 sm:$0xff]  }
  0x6f   :  { %1492 = vmatprep.subr.bf16.mxu0 %v2184_v0  ;;  %v2187_v2 = vld [vmem:[#allocation7 + $0x24] ss:$16 sps:$4 sm:$0xff]   ;;  %v2189_v3 = vld [vmem:[#allocation7 + $0x20] ss:$16 sps:$4 sm:$0xff]   ;;  %v2232_v13 = vld [vmem:[#allocation7 + $0xc] ss:$16 sps:$4 sm:$0xff]  }
  0x70   :  { %1494 = vmatpush1.bf16.msra.mxu0 %v2186_v1  ;;  %v2190_v4 = vld [vmem:[#allocation7 + $0x44] ss:$16 sps:$4 sm:$0xff]   ;;  %v2192_v5 = vld [vmem:[#allocation7 + $0x40] ss:$16 sps:$4 sm:$0xff]   ;;  %v2234_v15 = vld [vmem:[#allocation7 + $0x8] ss:$16 sps:$4 sm:$0xff]   ;;  %1556 = vmatprep.subr.bf16.mxu1 %v2232_v13 }
  0x71   :  { %1496 = vmatprep.subr.bf16.mxu0 %v2187_v2  ;;  %v2193_v6 = vld [vmem:[#allocation7 + $0x64] ss:$16 sps:$4 sm:$0xff]   ;;  %v2195_v7 = vld [vmem:[#allocation7 + $0x60] ss:$16 sps:$4 sm:$0xff]   ;;  %v2235_v18 = vld [vmem:[#allocation7 + $0x2c] ss:$16 sps:$4 sm:$0xff]   ;;  %1558 = vmatpush1.bf16.msra.mxu1 %v2234_v15 }
  0x72   :  { %v2196_v8 = vld [vmem:[#allocation7 + $0x84] ss:$16 sps:$4 sm:$0xff]   ;;  %v2198_v9 = vld [vmem:[#allocation7 + $0x80] ss:$16 sps:$4 sm:$0xff]   ;;  %v2237_v19 = vld [vmem:[#allocation7 + $0x28] ss:$16 sps:$4 sm:$0xff]   ;;  %1560 = vmatprep.subr.bf16.mxu1 %v2235_v18 }
  0x73   :  { %v2199_v10 = vld [vmem:[#allocation7 + $0xa4] ss:$16 sps:$4 sm:$0xff]   ;;  %v2201_v11 = vld [vmem:[#allocation7 + $0xa0] ss:$16 sps:$4 sm:$0xff]   ;;  %v2238_v20 = vld [vmem:[#allocation7 + $0x4c] ss:$16 sps:$4 sm:$0xff]  }
  0x74   :  { %1498 = vmatpush1.bf16.msra.mxu0 %v2189_v3  ;;  %v2202_v12 = vld [vmem:[#allocation7 + $0xc4] ss:$16 sps:$4 sm:$0xff]   ;;  %v2204_v16 = vld [vmem:[#allocation7 + $0xc0] ss:$16 sps:$4 sm:$0xff]   ;;  %v2240_v23 = vld [vmem:[#allocation7 + $0x48] ss:$16 sps:$4 sm:$0xff]  }
  0x75   :  { %1500 = vmatprep.subr.bf16.mxu0 %v2190_v4  ;;  %v118_v14 = vld [vmem:[#allocation2 + $0x8] sm:$0xff]  ;;  %1562 = vmatpush1.bf16.msra.mxu1 %v2237_v19  ;;  %v2241_v24 = vld [vmem:[#allocation7 + $0x6c] ss:$16 sps:$4 sm:$0xff]   ;;  %v2243_v27 = vld [vmem:[#allocation7 + $0x68] ss:$16 sps:$4 sm:$0xff]  }
  0x76   :  { %397 = vmatprep.mubr.f32.mxu0 %v118_v14  ;;  %v2205_v17 = vld [vmem:[#allocation7 + $0xe4] ss:$16 sps:$4 sm:$0xff]   ;;  %468 = vmatprep.mubr.f32.mxu1 %v118_v14  ;;  %v2207_v21 = vld [vmem:[#allocation7 + $0xe0] ss:$16 sps:$4 sm:$0xff]   ;;  %v2244_v28 = vld [vmem:[#allocation7 + $0x8c] ss:$16 sps:$4 sm:$0xff]  }
  0x77   :  { %v2208_v22 = vld [vmem:[#allocation7 + $0x104] ss:$16 sps:$4 sm:$0xff]   ;;  %1564 = vmatprep.subr.bf16.mxu1 %v2238_v20  ;;  %v2210_v25 = vld [vmem:[#allocation7 + $0x100] ss:$16 sps:$4 sm:$0xff]   ;;  %v2246_v31 = vld [vmem:[#allocation7 + $0x88] ss:$16 sps:$4 sm:$0xff]  }
  0x78   :  { %1502 = vmatpush1.bf16.msra.mxu0 %v2192_v5  ;;  %v2211_v26 = vld [vmem:[#allocation7 + $0x124] ss:$16 sps:$4 sm:$0xff]   ;;  %v2213_v29 = vld [vmem:[#allocation7 + $0x120] ss:$16 sps:$4 sm:$0xff]   ;;  %v2247_v32 = vld [vmem:[#allocation7 + $0xac] ss:$16 sps:$4 sm:$0xff]  }
  0x79   :  { %1504 = vmatprep.subr.bf16.mxu0 %v2193_v6  ;;  %1566 = vmatpush1.bf16.msra.mxu1 %v2240_v23  ;;  %v2214_v30 = vld [vmem:[#allocation7 + $0x144] ss:$16 sps:$4 sm:$0xff]   ;;  %v2216_v33 = vld [vmem:[#allocation7 + $0x140] ss:$16 sps:$4 sm:$0xff]   ;;  %v2249_v35 = vld [vmem:[#allocation7 + $0xa8] ss:$16 sps:$4 sm:$0xff]  }
  0x7a   :  { %1568 = vmatprep.subr.bf16.mxu1 %v2241_v24  ;;  %v2217_v34 = vld [vmem:[#allocation7 + $0x164] ss:$16 sps:$4 sm:$0xff]   ;;  %v2250_v36 = vld [vmem:[#allocation7 + $0xcc] ss:$16 sps:$4 sm:$0xff]   ;;  %v2219_v37 = vld [vmem:[#allocation7 + $0x160] ss:$16 sps:$4 sm:$0xff]  }
  0x7b   :  { %v2220_v38 = vld [vmem:[#allocation7 + $0x184] ss:$16 sps:$4 sm:$0xff]   ;;  %v2252_v39 = vld [vmem:[#allocation7 + $0xc8] ss:$16 sps:$4 sm:$0xff]   ;;  %v2253_v40 = vld [vmem:[#allocation7 + $0xec] ss:$16 sps:$4 sm:$0xff]  }
  0x7c   :  { %1506 = vmatpush1.bf16.msra.mxu0 %v2195_v7  ;;  %v2222_v41 = vld [vmem:[#allocation7 + $0x180] ss:$16 sps:$4 sm:$0xff]   ;;  %v2223_v42 = vld [vmem:[#allocation7 + $0x1a4] ss:$16 sps:$4 sm:$0xff]   ;;  %v2255_v43 = vld [vmem:[#allocation7 + $0xe8] ss:$16 sps:$4 sm:$0xff]  }
  0x7d   :  { %1508 = vmatprep.subr.bf16.mxu0 %v2196_v8  ;;  %1570 = vmatpush1.bf16.msra.mxu1 %v2243_v27  ;;  %v2256_v44 = vld [vmem:[#allocation7 + $0x10c] ss:$16 sps:$4 sm:$0xff]   ;;  %v2225_v45 = vld [vmem:[#allocation7 + $0x1a0] ss:$16 sps:$4 sm:$0xff]   ;;  %v2226_v46 = vld [vmem:[#allocation7 + $0x1c4] ss:$16 sps:$4 sm:$0xff]  }
  0x7e   :  { %1572 = vmatprep.subr.bf16.mxu1 %v2244_v28  ;;  %v2258_v47 = vld [vmem:[#allocation7 + $0x108] ss:$16 sps:$4 sm:$0xff]   ;;  %v2259_v48 = vld [vmem:[#allocation7 + $0x12c] ss:$16 sps:$4 sm:$0xff]   ;;  %v2228_v49 = vld [vmem:[#allocation7 + $0x1c0] ss:$16 sps:$4 sm:$0xff]  }
  0x7f   :  { %v2229_v50 = vld [vmem:[#allocation7 + $0x1e4] ss:$16 sps:$4 sm:$0xff]   ;;  %v2261_v51 = vld [vmem:[#allocation7 + $0x128] ss:$16 sps:$4 sm:$0xff]   ;;  %v2262_v52 = vld [vmem:[#allocation7 + $0x14c] ss:$16 sps:$4 sm:$0xff]  }
  0x80   :  { %1510 = vmatpush1.bf16.msra.mxu0 %v2198_v9  ;;  %v2231_v53 = vld [vmem:[#allocation7 + $0x1e0] ss:$16 sps:$4 sm:$0xff]   ;;  %v2280_v54 = vld [vmem:[#allocation8 + $0x4] ss:$8 sps:$4 sm:$0xff]   ;;  %v2264_v56 = vld [vmem:[#allocation7 + $0x148] ss:$16 sps:$4 sm:$0xff]  }
  0x81   :  { %1512 = vmatprep.subr.bf16.mxu0 %v2199_v10  ;;  %1574 = vmatpush1.bf16.msra.mxu1 %v2246_v31  ;;  %v117_v55 = vld [vmem:[#allocation2] sm:$0xff]  ;;  %v2283_v60 = vld [vmem:[#allocation8 + $0x14] ss:$8 sps:$4 sm:$0xff]   ;;  %v2285_v62 = vld [vmem:[#allocation8 + $0x10] ss:$8 sps:$4 sm:$0xff]  }
  0x82   :  { %1576 = vmatprep.subr.bf16.mxu1 %v2247_v32  ;;  %v2265_v57 = vld [vmem:[#allocation7 + $0x16c] ss:$16 sps:$4 sm:$0xff]   ;;  %v2267_v58 = vld [vmem:[#allocation7 + $0x168] ss:$16 sps:$4 sm:$0xff]  }
  0x83   :  { %v2282_v59 = vld [vmem:[#allocation8] ss:$8 sps:$4 sm:$0xff]   ;;  %v2268_v61 = vld [vmem:[#allocation7 + $0x18c] ss:$16 sps:$4 sm:$0xff]   ;;  %v2291_v6 = vld [vmem:[#allocation8 + $0x30] ss:$8 sps:$4 sm:$0xff]  }
  0x84   :  { %1514 = vmatpush1.bf16.msra.mxu0 %v2201_v11  ;;  %v2286_v63 = vld [vmem:[#allocation8 + $0x24] ss:$8 sps:$4 sm:$0xff]   ;;  %v2270_v0 = vld [vmem:[#allocation7 + $0x188] ss:$16 sps:$4 sm:$0xff]   ;;  %v2289_v3 = vld [vmem:[#allocation8 + $0x34] ss:$8 sps:$4 sm:$0xff]  }
  0x85   :  { %1516 = vmatprep.subr.bf16.mxu0 %v2202_v12  ;;  %1578 = vmatpush1.bf16.msra.mxu1 %v2249_v35  ;;  %v2271_v1 = vld [vmem:[#allocation7 + $0x1ac] ss:$16 sps:$4 sm:$0xff]   ;;  %v2288_v2 = vld [vmem:[#allocation8 + $0x20] ss:$8 sps:$4 sm:$0xff]   ;;  %v2297_v13 = vld [vmem:[#allocation8 + $0x50] ss:$8 sps:$4 sm:$0xff]  }
  0x86   :  { %1580 = vmatprep.subr.bf16.mxu1 %v2250_v36  ;;  %v2273_v4 = vld [vmem:[#allocation7 + $0x1a8] ss:$16 sps:$4 sm:$0xff]   ;;  %v2274_v5 = vld [vmem:[#allocation7 + $0x1cc] ss:$16 sps:$4 sm:$0xff]  }
  0x87   :  { %v2292_v7 = vld [vmem:[#allocation8 + $0x44] ss:$8 sps:$4 sm:$0xff]   ;;  %v2276_v8 = vld [vmem:[#allocation7 + $0x1c8] ss:$16 sps:$4 sm:$0xff]   ;;  %v2295_v11 = vld [vmem:[#allocation8 + $0x54] ss:$8 sps:$4 sm:$0xff]  }
  0x88   :  { %1518 = vmatpush1.bf16.msra.mxu0 %v2204_v16  ;;  %v2277_v9 = vld [vmem:[#allocation7 + $0x1ec] ss:$16 sps:$4 sm:$0xff]   ;;  %v2294_v10 = vld [vmem:[#allocation8 + $0x40] ss:$8 sps:$4 sm:$0xff]  }
  0x89   :  { %1520 = vmatprep.subr.bf16.mxu0 %v2205_v17  ;;  %1582 = vmatpush1.bf16.msra.mxu1 %v2252_v39  ;;  %v2279_v12 = vld [vmem:[#allocation7 + $0x1e8] ss:$16 sps:$4 sm:$0xff]   ;;  %v2298_v14 = vld [vmem:[#allocation8 + $0x64] ss:$8 sps:$4 sm:$0xff]   ;;  %v2301_v16 = vld [vmem:[#allocation8 + $0x74] ss:$8 sps:$4 sm:$0xff]  }
  0x8a   :  { %1584 = vmatprep.subr.bf16.mxu1 %v2253_v40  ;;  %v2300_v15 = vld [vmem:[#allocation8 + $0x60] ss:$8 sps:$4 sm:$0xff]   ;;  %v2303_v17 = vld [vmem:[#allocation8 + $0x70] ss:$8 sps:$4 sm:$0xff]   ;;  %v2304_v18 = vld [vmem:[#allocation8 + $0x84] ss:$8 sps:$4 sm:$0xff]  }
  0x8b   :  { %v2306_v19 = vld [vmem:[#allocation8 + $0x80] ss:$8 sps:$4 sm:$0xff]   ;;  %v2307_v20 = vld [vmem:[#allocation8 + $0x94] ss:$8 sps:$4 sm:$0xff]  }
  0x8c   :  { %1522 = vmatpush1.bf16.msra.mxu0 %v2207_v21  ;;  %v2309_v21 = vld [vmem:[#allocation8 + $0x90] ss:$8 sps:$4 sm:$0xff]   ;;  %v2312_v23 = vld [vmem:[#allocation8 + $0xa0] ss:$8 sps:$4 sm:$0xff]   ;;  %v2313_v24 = vld [vmem:[#allocation8 + $0xb4] ss:$8 sps:$4 sm:$0xff]  }
  0x8d   :  { %1524 = vmatprep.subr.bf16.mxu0 %v2208_v22  ;;  %1586 = vmatpush1.bf16.msra.mxu1 %v2255_v43  ;;  %v2310_v22 = vld [vmem:[#allocation8 + $0xa4] ss:$8 sps:$4 sm:$0xff]   ;;  %v2318_v27 = vld [vmem:[#allocation8 + $0xc0] ss:$8 sps:$4 sm:$0xff]   ;;  %v2319_v28 = vld [vmem:[#allocation8 + $0xd4] ss:$8 sps:$4 sm:$0xff]  }
  0x8e   :  { %1588 = vmatprep.subr.bf16.mxu1 %v2256_v44  ;;  %v2324_v31 = vld [vmem:[#allocation8 + $0xe0] ss:$8 sps:$4 sm:$0xff]   ;;  %v2325_v32 = vld [vmem:[#allocation8 + $0xf4] ss:$8 sps:$4 sm:$0xff]  }
  0x8f   :  { %v2379_v35 = vld [vmem:[#allocation10 + $0xc] ss:$16 sps:$4 sm:$0xff]   ;;  %v2381_v36 = vld [vmem:[#allocation10 + $0x8] ss:$16 sps:$4 sm:$0xff]  }
  0x90   :  { %1526 = vmatpush1.bf16.msra.mxu0 %v2210_v25  ;;  %v2315_v25 = vld [vmem:[#allocation8 + $0xb0] ss:$8 sps:$4 sm:$0xff]   ;;  %v2391_v39 = vld [vmem:[#allocation10 + $0x4c] ss:$16 sps:$4 sm:$0xff]   ;;  %v2898_v44 = vld [vmem:[%s2970_s3] sm:$0xf] }
  0x91   :  { %1528 = vmatprep.subr.bf16.mxu0 %v2211_v26  ;;  %1590 = vmatpush1.bf16.msra.mxu1 %v2258_v47  ;;  %v2316_v26 = vld [vmem:[#allocation8 + $0xc4] ss:$8 sps:$4 sm:$0xff]   ;;  %v2393_v40 = vld [vmem:[#allocation10 + $0x48] ss:$16 sps:$4 sm:$0xff]  }
  0x92   :  { %1592 = vmatprep.subr.bf16.mxu1 %v2259_v48 }
  0x94   :  { %1530 = vmatpush1.bf16.msra.mxu0 %v2213_v29  ;;  %v2321_v29 = vld [vmem:[#allocation8 + $0xd0] ss:$8 sps:$4 sm:$0xff]  }
  0x95   :  { %1532 = vmatprep.subr.bf16.mxu0 %v2214_v30  ;;  %1594 = vmatpush1.bf16.msra.mxu1 %v2261_v51  ;;  %v2322_v30 = vld [vmem:[#allocation8 + $0xe4] ss:$8 sps:$4 sm:$0xff]  }
  0x96   :  { %1596 = vmatprep.subr.bf16.mxu1 %v2262_v52 }
  0x98   :  { %1534 = vmatpush1.bf16.msra.mxu0 %v2216_v33  ;;  %v2327_v33 = vld [vmem:[#allocation8 + $0xf0] ss:$8 sps:$4 sm:$0xff]  }
  0x99   :  { %1536 = vmatprep.subr.bf16.mxu0 %v2217_v34  ;;  %1598 = vmatpush1.bf16.msra.mxu1 %v2264_v56  ;;  %v2328_v34 = vld [vmem:[#allocation8 + $0x104] ss:$8 sps:$4 sm:$0xff]   ;;  %v2333_v56 = vld [vmem:[#allocation8 + $0x110] ss:$8 sps:$4 sm:$0xff]  }
  0x9a   :  { %1600 = vmatprep.subr.bf16.mxu1 %v2265_v57  ;;  %v2334_v57 = vld [vmem:[#allocation8 + $0x124] ss:$8 sps:$4 sm:$0xff]  }
  0x9c   :  { %1538 = vmatpush1.bf16.msra.mxu0 %v2219_v37  ;;  %v2385_v37 = vld [vmem:[#allocation10 + $0x2c] ss:$16 sps:$4 sm:$0xff]  }
  0x9d   :  { %1540 = vmatprep.subr.bf16.mxu0 %v2220_v38  ;;  %1602 = vmatpush1.bf16.msra.mxu1 %v2267_v58  ;;  %v2387_v38 = vld [vmem:[#allocation10 + $0x28] ss:$16 sps:$4 sm:$0xff]  }
  0x9e   :  { %1604 = vmatprep.subr.bf16.mxu1 %v2268_v61  ;;  %v2336_v58 = vld [vmem:[#allocation8 + $0x120] ss:$8 sps:$4 sm:$0xff]  }
  0xa0   :  { %1542 = vmatpush1.bf16.msra.mxu0 %v2222_v41  ;;  %v313_v41 = vlaneseq }
  0xa1   :  { %1544 = vmatprep.subr.bf16.mxu0 %v2223_v42  ;;  %1606 = vmatpush1.bf16.msra.mxu1 %v2270_v0 }
  0xa2   :  { %1608 = vmatprep.subr.bf16.mxu1 %v2271_v1  ;;  %v2890_v42 = vshrl.u32 %v313_v41, 7  ;;  %v2343_v1 = vld [vmem:[#allocation8 + $0x154] ss:$8 sps:$4 sm:$0xff]  }
  0xa3   :  { %v2400_v41 = vld [vmem:[#allocation10 + $0x84] ss:$16 sps:$4 sm:$0xff]  }
  0xa4   :  { %1546 = vmatpush1.bf16.msra.mxu0 %v2225_v45  ;;  %v2893_v43 = vsub.s32 0, %v2890_v42  ;;  %v2901_v45 = vsub.s32 1, %v2890_v42  ;;  %v327_v61 = vsub.s32 3, %v2890_v42 }
  0xa5   :  { %1548 = vmatprep.subr.bf16.mxu0 %v2226_v46  ;;  %1610 = vmatpush1.bf16.msra.mxu1 %v2273_v4  ;;  %v2345_v4 = vld [vmem:[#allocation8 + $0x150] ss:$8 sps:$4 sm:$0xff]  }
  0xa6   :  { %1612 = vmatprep.subr.bf16.mxu1 %v2274_v5  ;;  %v316_v46 = vrot.slane %v2898_v44, %v2893_v43  ;;  %v320_v47 = vrot.slane %v2898_v44, %v2901_v45  ;;  %v328_v0 = vrot.slane %v2898_v44, %v327_v61 }
  0xa8   :  { %1550 = vmatpush1.bf16.msra.mxu0 %v2228_v49 }
  0xa9   :  { %1552 = vmatprep.subr.bf16.mxu0 %v2229_v50  ;;  %1614 = vmatpush1.bf16.msra.mxu1 %v2276_v8  ;;  %v2348_v8 = vld [vmem:[#allocation8 + $0x160] ss:$8 sps:$4 sm:$0xff]  }
  0xaa   :  { %1616 = vmatprep.subr.bf16.mxu1 %v2277_v9  ;;  %v2349_v9 = vld [vmem:[#allocation8 + $0x174] ss:$8 sps:$4 sm:$0xff]  }
  0xac   :  { %1554 = vmatpush1.bf16.msra.mxu0 %v2231_v53  ;;  %v2330_v53 = vld [vmem:[#allocation8 + $0x100] ss:$8 sps:$4 sm:$0xff]  }
  0xad   :  { %1620 = vmatprep.subr.bf16.mxu0 %v2280_v54  ;;  %1618 = vmatpush1.bf16.msra.mxu1 %v2279_v12  ;;  %v2354_v12 = vld [vmem:[#allocation8 + $0x180] ss:$8 sps:$4 sm:$0xff]  }
  0xae   :  { %1780 = vmatprep.subr.bf16.mxu1 %v2379_v35  ;;  %v2388_v35 = vld [vmem:[#allocation10 + $0x44] ss:$16 sps:$4 sm:$0xff]  }
  0xaf   :  { %398 = vmatmul.mubr.f32.vlgmr.msra.gmra.mrb[0].mxu0 %v117_v55 }
  0xb0   :  { %1622 = vmatpush1.bf16.msra.mxu0 %v2282_v59  ;;  %469 = vmatmul.mubr.f32.vlgmr.msra.gmra.mrb[0].mxu1 %v117_v55  ;;  %v2331_v55 = vld [vmem:[#allocation8 + $0x114] ss:$8 sps:$4 sm:$0xff]  }
  0xb1   :  { %1624 = vmatprep.subr.bf16.mxu0 %v2283_v60  ;;  %1782 = vmatpush1.bf16.msra.mxu1 %v2381_v36  ;;  %v2337_v59 = vld [vmem:[#allocation8 + $0x134] ss:$8 sps:$4 sm:$0xff]   ;;  %v2339_v60 = vld [vmem:[#allocation8 + $0x130] ss:$8 sps:$4 sm:$0xff]  }
  0xb2   :  { %1784 = vmatprep.subr.bf16.mxu1 %v2385_v37  ;;  %v2390_v36 = vld [vmem:[#allocation10 + $0x40] ss:$16 sps:$4 sm:$0xff]   ;;  %v2394_v37 = vld [vmem:[#allocation10 + $0x64] ss:$16 sps:$4 sm:$0xff]  }
  0xb4   :  { %1626 = vmatpush1.bf16.msra.mxu0 %v2285_v62  ;;  %v2340_v62 = vld [vmem:[#allocation8 + $0x144] ss:$8 sps:$4 sm:$0xff]  }
  0xb5   :  { %1628 = vmatprep.subr.bf16.mxu0 %v2286_v63  ;;  %1786 = vmatpush1.bf16.msra.mxu1 %v2387_v38  ;;  %v2342_v63 = vld [vmem:[#allocation8 + $0x140] ss:$8 sps:$4 sm:$0xff]   ;;  %v2397_v38 = vld [vmem:[#allocation10 + $0x6c] ss:$16 sps:$4 sm:$0xff]  }
  0xb6   :  { %1788 = vmatprep.subr.bf16.mxu1 %v2391_v39  ;;  %v2396_v39 = vld [vmem:[#allocation10 + $0x60] ss:$16 sps:$4 sm:$0xff]  }
  0xb8   :  { %1630 = vmatpush1.bf16.msra.mxu0 %v2288_v2 }
  0xb9   :  { %1632 = vmatprep.subr.bf16.mxu0 %v2289_v3  ;;  %1790 = vmatpush1.bf16.msra.mxu1 %v2393_v40  ;;  %v2399_v40 = vld [vmem:[#allocation10 + $0x68] ss:$16 sps:$4 sm:$0xff]  }
  0xba   :  { %1792 = vmatprep.subr.bf16.mxu1 %v2397_v38  ;;  %v2463_v38 = vld [vmem:[#allocation11 + $0xd4] ss:$8 sps:$4 sm:$0xff]  }
  0xbc   :  { %1634 = vmatpush1.bf16.msra.mxu0 %v2291_v6  ;;  %v2346_v6 = vld [vmem:[#allocation8 + $0x164] ss:$8 sps:$4 sm:$0xff]  }
  0xbd   :  { %1636 = vmatprep.subr.bf16.mxu0 %v2292_v7  ;;  %1794 = vmatpush1.bf16.msra.mxu1 %v2399_v40  ;;  %v2466_v40 = vld [vmem:[#allocation11 + $0xe4] ss:$8 sps:$4 sm:$0xff]  }
  0xc0   :  { %1638 = vmatpush1.bf16.msra.mxu0 %v2294_v10  ;;  %v2351_v10 = vld [vmem:[#allocation8 + $0x170] ss:$8 sps:$4 sm:$0xff]  }
  0xc1   :  { %1640 = vmatprep.subr.bf16.mxu0 %v2295_v11  ;;  %v2352_v11 = vld [vmem:[#allocation8 + $0x184] ss:$8 sps:$4 sm:$0xff]  }
  0xc4   :  { %1642 = vmatpush1.bf16.msra.mxu0 %v2297_v13  ;;  %v2355_v13 = vld [vmem:[#allocation8 + $0x194] ss:$8 sps:$4 sm:$0xff]  }
  0xc5   :  { %1644 = vmatprep.subr.bf16.mxu0 %v2298_v14  ;;  %v2357_v14 = vld [vmem:[#allocation8 + $0x190] ss:$8 sps:$4 sm:$0xff]  }
  0xc8   :  { %1646 = vmatpush1.bf16.msra.mxu0 %v2300_v15  ;;  %v2358_v15 = vld [vmem:[#allocation8 + $0x1a4] ss:$8 sps:$4 sm:$0xff]  }
  0xc9   :  { %1648 = vmatprep.subr.bf16.mxu0 %v2301_v16  ;;  %v2360_v16 = vld [vmem:[#allocation8 + $0x1a0] ss:$8 sps:$4 sm:$0xff]  }
  0xcc   :  { %1650 = vmatpush1.bf16.msra.mxu0 %v2303_v17  ;;  %v2361_v17 = vld [vmem:[#allocation8 + $0x1b4] ss:$8 sps:$4 sm:$0xff]  }
  0xcd   :  { %1652 = vmatprep.subr.bf16.mxu0 %v2304_v18  ;;  %v2363_v18 = vld [vmem:[#allocation8 + $0x1b0] ss:$8 sps:$4 sm:$0xff]  }
  0xd0   :  { %1654 = vmatpush1.bf16.msra.mxu0 %v2306_v19  ;;  %v2364_v19 = vld [vmem:[#allocation8 + $0x1c4] ss:$8 sps:$4 sm:$0xff]  }
  0xd1   :  { %1656 = vmatprep.subr.bf16.mxu0 %v2307_v20  ;;  %v2366_v20 = vld [vmem:[#allocation8 + $0x1c0] ss:$8 sps:$4 sm:$0xff]  }
  0xd4   :  { %1658 = vmatpush1.bf16.msra.mxu0 %v2309_v21  ;;  %v2367_v21 = vld [vmem:[#allocation8 + $0x1d4] ss:$8 sps:$4 sm:$0xff]  }
  0xd5   :  { %1660 = vmatprep.subr.bf16.mxu0 %v2310_v22  ;;  %v2369_v22 = vld [vmem:[#allocation8 + $0x1d0] ss:$8 sps:$4 sm:$0xff]  }
  0xd8   :  { %1662 = vmatpush1.bf16.msra.mxu0 %v2312_v23  ;;  %v323_v23 = vsub.s32 2, %v2890_v42 }
  0xd9   :  { %1664 = vmatprep.subr.bf16.mxu0 %v2313_v24  ;;  %v2370_v24 = vld [vmem:[#allocation8 + $0x1e4] ss:$8 sps:$4 sm:$0xff]  }
  0xdc   :  { %1666 = vmatpush1.bf16.msra.mxu0 %v2315_v25  ;;  %v2372_v25 = vld [vmem:[#allocation8 + $0x1e0] ss:$8 sps:$4 sm:$0xff]  }
  0xdd   :  { %1668 = vmatprep.subr.bf16.mxu0 %v2316_v26  ;;  %v324_v26 = vrot.slane %v2898_v44, %v323_v23  ;;  %v2403_v44 = vld [vmem:[#allocation10 + $0x8c] ss:$16 sps:$4 sm:$0xff]  }
  0xde   :  { %1796 = vmatprep.subr.bf16.mxu1 %v2403_v44  ;;  %v2469_v44 = vld [vmem:[#allocation11 + $0xf4] ss:$8 sps:$4 sm:$0xff]  }
  0xe0   :  { %1670 = vmatpush1.bf16.msra.mxu0 %v2318_v27  ;;  %v2373_v27 = vld [vmem:[#allocation8 + $0x1f4] ss:$8 sps:$4 sm:$0xff]  }
  0xe1   :  { %1672 = vmatprep.subr.bf16.mxu0 %v2319_v28  ;;  %v2375_v28 = vld [vmem:[#allocation8 + $0x1f0] ss:$8 sps:$4 sm:$0xff]  }
  0xe4   :  { %1674 = vmatpush1.bf16.msra.mxu0 %v2321_v29 }
  0xe5   :  { %1676 = vmatprep.subr.bf16.mxu0 %v2322_v30  ;;  %v2376_v30 = vld [vmem:[#allocation10 + $0x4] ss:$16 sps:$4 sm:$0xff]  }
  0xe8   :  { %1678 = vmatpush1.bf16.msra.mxu0 %v2324_v31  ;;  %v2378_v31 = vld [vmem:[#allocation10] ss:$16 sps:$4 sm:$0xff]  }
  0xe9   :  { %1680 = vmatprep.subr.bf16.mxu0 %v2325_v32 }
  0xec   :  { %1682 = vmatpush1.bf16.msra.mxu0 %v2327_v33  ;;  %v2382_v33 = vld [vmem:[#allocation10 + $0x24] ss:$16 sps:$4 sm:$0xff]  }
  0xed   :  { %1684 = vmatprep.subr.bf16.mxu0 %v2328_v34  ;;  %v2384_v34 = vld [vmem:[#allocation10 + $0x20] ss:$16 sps:$4 sm:$0xff]  }
 0x182   :  { %v399_v48 = vpop.f32.mrb[0].mxu0 }
 0x183   :  { %v400_v49 = vadd.f32 %v399_v48, %v316_v46  ;;  %v401_v50 = vpop.f32.mrb[1].mxu0  ;;  %v470_v2 = vpop.f32.mrb[0].mxu1  ;;  %v2402_v46 = vld [vmem:[#allocation10 + $0x80] ss:$16 sps:$4 sm:$0xff]   ;;  %v2406_v48 = vld [vmem:[#allocation10 + $0xa4] ss:$16 sps:$4 sm:$0xff]  }
 0x184   :  { %v402_v51 = vadd.f32 %v401_v50, %v320_v47  ;;  %v472_v3 = vpop.f32.mrb[1].mxu1  ;;  %v471_v29 = vadd.f32 %v470_v2, %v324_v26  ;;  %v2405_v47 = vld [vmem:[#allocation10 + $0x88] ss:$16 sps:$4 sm:$0xff]   ;;  %v2409_v50 = vld [vmem:[#allocation10 + $0xac] ss:$16 sps:$4 sm:$0xff]  }
 0x185   :  { %v475_v54 = vmax.f32 %v400_v49, 0.0  ;;  %v473_v5 = vadd.f32 %v472_v3, %v328_v0  ;;  %1798 = vmatpush1.bf16.msra.mxu1 %v2405_v47  ;;  %v2408_v49 = vld [vmem:[#allocation10 + $0xa0] ss:$16 sps:$4 sm:$0xff]   ;;  %v2445_v26 = vld [vmem:[#allocation11 + $0x74] ss:$8 sps:$4 sm:$0xff]  }
 0x186   :  { %v476_v52 = vmax.f32 %v402_v51, 0.0  ;;  %v477_v32 = vmax.f32 %v471_v29, 0.0  ;;  %v2411_v51 = vld [vmem:[#allocation10 + $0xa8] ss:$16 sps:$4 sm:$0xff]   ;;  %1800 = vmatprep.subr.bf16.mxu1 %v2409_v50  ;;  %v2472_v47 = vld [vmem:[#allocation11 + $0x104] ss:$8 sps:$4 sm:$0xff]  }
 0x187   :  { %v478_v7 = vmax.f32 %v473_v5, 0.0  ;;  %v2450_v29 = vld [vmem:[#allocation11 + $0x80] ss:$8 sps:$4 sm:$0xff]  }
 0x188   :  { %747 = vmatprep.mubr.f32.mxu0 %v476_v52  ;;  %v2412_v52 = vld [vmem:[#allocation10 + $0xc4] ss:$16 sps:$4 sm:$0xff]  }
 0x189   :  { %748 = vmatmul.mubr.f32.vlgmr.msra.gmra.mrb[2].mxu0 %v475_v54  ;;  %1802 = vmatpush1.bf16.msra.mxu1 %v2411_v51  ;;  %v2414_v54 = vld [vmem:[#allocation10 + $0xc0] ss:$16 sps:$4 sm:$0xff]  }
 0x18a   :  { %1686 = vmatpush1.bf16.msra.mxu0 %v2330_v53  ;;  %818 = vmatprep.mubr.f32.mxu0 %v478_v7  ;;  %v2415_v53 = vld [vmem:[#allocation10 + $0xcc] ss:$16 sps:$4 sm:$0xff]  }
 0x18b   :  { %1688 = vmatprep.subr.bf16.mxu0 %v2331_v55  ;;  %v2417_v55 = vld [vmem:[#allocation10 + $0xc8] ss:$16 sps:$4 sm:$0xff]   ;;  %1804 = vmatprep.subr.bf16.mxu1 %v2415_v53 }
 0x18d   :  { %1806 = vmatpush1.bf16.msra.mxu1 %v2417_v55 }
 0x18e   :  { %1690 = vmatpush1.bf16.msra.mxu0 %v2333_v56  ;;  %v2418_v56 = vld [vmem:[#allocation10 + $0xe4] ss:$16 sps:$4 sm:$0xff]  }
 0x18f   :  { %1692 = vmatprep.subr.bf16.mxu0 %v2334_v57  ;;  %v2421_v57 = vld [vmem:[#allocation10 + $0xec] ss:$16 sps:$4 sm:$0xff]  }
 0x190   :  { %1808 = vmatprep.subr.bf16.mxu1 %v2421_v57 }
 0x192   :  { %1694 = vmatpush1.bf16.msra.mxu0 %v2336_v58  ;;  %v2728_v58 = vmov 0.0  }
 0x193   :  { %1696 = vmatprep.subr.bf16.mxu0 %v2337_v59  ;;  %1086 = vmatprep.mubr.f32.mxu1 %v2728_v58  ;;  %v2420_v59 = vld [vmem:[#allocation10 + $0xe0] ss:$16 sps:$4 sm:$0xff]  }
 0x196   :  { %1698 = vmatpush1.bf16.msra.mxu0 %v2339_v60  ;;  %v2423_v60 = vld [vmem:[#allocation10 + $0xe8] ss:$16 sps:$4 sm:$0xff]  }
 0x197   :  { %1700 = vmatprep.subr.bf16.mxu0 %v2340_v62  ;;  %1810 = vmatpush1.bf16.msra.mxu1 %v2423_v60  ;;  %v2424_v62 = vld [vmem:[#allocation11 + $0x4] ss:$8 sps:$4 sm:$0xff]   ;;  %v2474_v60 = vld [vmem:[#allocation11 + $0x100] ss:$8 sps:$4 sm:$0xff]  }
 0x198   :  { %1812 = vmatprep.subr.bf16.mxu1 %v2424_v62 }
 0x19a   :  { %1702 = vmatpush1.bf16.msra.mxu0 %v2342_v63  ;;  %v671_v63 = vld [vmem:[%s2972_s5] sm:$0x3] }
 0x19b   :  { %1704 = vmatprep.subr.bf16.mxu0 %v2343_v1  ;;  %v676_v0 = vrot.slane %v671_v63, %v2893_v43  ;;  %v680_v1 = vrot.slane %v671_v63, %v2901_v45  ;;  %v2475_v63 = vld [vmem:[#allocation11 + $0x114] ss:$8 sps:$4 sm:$0xff]  }
 0x19e   :  { %1706 = vmatpush1.bf16.msra.mxu0 %v2345_v4 }
 0x19f   :  { %1708 = vmatprep.subr.bf16.mxu0 %v2346_v6 }
 0x1a2   :  { %1710 = vmatpush1.bf16.msra.mxu0 %v2348_v8  ;;  %v827_v8 = vld [vmem:[#allocation5] sm:$0xff] }
 0x1a3   :  { %1712 = vmatprep.subr.bf16.mxu0 %v2349_v9 }
 0x1a6   :  { %1714 = vmatpush1.bf16.msra.mxu0 %v2351_v10 }
 0x1a7   :  { %1716 = vmatprep.subr.bf16.mxu0 %v2352_v11  ;;  %v2426_v11 = vld [vmem:[#allocation11] ss:$8 sps:$4 sm:$0xff]  }
 0x1aa   :  { %1718 = vmatpush1.bf16.msra.mxu0 %v2354_v12 }
 0x1ab   :  { %1720 = vmatprep.subr.bf16.mxu0 %v2355_v13  ;;  %v2427_v13 = vld [vmem:[#allocation11 + $0x14] ss:$8 sps:$4 sm:$0xff]  }
 0x1ae   :  { %1722 = vmatpush1.bf16.msra.mxu0 %v2357_v14  ;;  %v2429_v14 = vld [vmem:[#allocation11 + $0x10] ss:$8 sps:$4 sm:$0xff]  }
 0x1af   :  { %1724 = vmatprep.subr.bf16.mxu0 %v2358_v15  ;;  %v2430_v15 = vld [vmem:[#allocation11 + $0x24] ss:$8 sps:$4 sm:$0xff]  }
 0x1b2   :  { %1726 = vmatpush1.bf16.msra.mxu0 %v2360_v16  ;;  %v2432_v16 = vld [vmem:[#allocation11 + $0x20] ss:$8 sps:$4 sm:$0xff]  }
 0x1b3   :  { %1728 = vmatprep.subr.bf16.mxu0 %v2361_v17  ;;  %v2433_v17 = vld [vmem:[#allocation11 + $0x34] ss:$8 sps:$4 sm:$0xff]  }
 0x1b6   :  { %1730 = vmatpush1.bf16.msra.mxu0 %v2363_v18  ;;  %v2435_v18 = vld [vmem:[#allocation11 + $0x30] ss:$8 sps:$4 sm:$0xff]  }
 0x1b7   :  { %1732 = vmatprep.subr.bf16.mxu0 %v2364_v19  ;;  %v2436_v19 = vld [vmem:[#allocation11 + $0x44] ss:$8 sps:$4 sm:$0xff]  }
 0x1ba   :  { %1734 = vmatpush1.bf16.msra.mxu0 %v2366_v20  ;;  %v2438_v20 = vld [vmem:[#allocation11 + $0x40] ss:$8 sps:$4 sm:$0xff]  }
 0x1bb   :  { %1736 = vmatprep.subr.bf16.mxu0 %v2367_v21  ;;  %v2439_v21 = vld [vmem:[#allocation11 + $0x54] ss:$8 sps:$4 sm:$0xff]  }
 0x1be   :  { %1738 = vmatpush1.bf16.msra.mxu0 %v2369_v22  ;;  %v2441_v22 = vld [vmem:[#allocation11 + $0x50] ss:$8 sps:$4 sm:$0xff]  }
 0x1bf   :  { %1740 = vmatprep.subr.bf16.mxu0 %v2370_v24  ;;  %v2442_v24 = vld [vmem:[#allocation11 + $0x64] ss:$8 sps:$4 sm:$0xff]  }
 0x1c2   :  { %1742 = vmatpush1.bf16.msra.mxu0 %v2372_v25  ;;  %v2444_v25 = vld [vmem:[#allocation11 + $0x60] ss:$8 sps:$4 sm:$0xff]  }
 0x1c3   :  { %1744 = vmatprep.subr.bf16.mxu0 %v2373_v27  ;;  %v2447_v27 = vld [vmem:[#allocation11 + $0x70] ss:$8 sps:$4 sm:$0xff]  }
 0x1c6   :  { %1746 = vmatpush1.bf16.msra.mxu0 %v2375_v28  ;;  %v2448_v28 = vld [vmem:[#allocation11 + $0x84] ss:$8 sps:$4 sm:$0xff]  }
 0x1c7   :  { %1748 = vmatprep.subr.bf16.mxu0 %v2376_v30  ;;  %v2451_v30 = vld [vmem:[#allocation11 + $0x94] ss:$8 sps:$4 sm:$0xff]  }
 0x1c9   :  { %819 = vmatmul.mubr.f32.vlgmr.msra.gmra.mrb[2].mxu0 %v477_v32  ;;  %v2454_v32 = vld [vmem:[#allocation11 + $0xa4] ss:$8 sps:$4 sm:$0xff]  }
 0x1ca   :  { %1750 = vmatpush1.bf16.msra.mxu0 %v2378_v31  ;;  %1015 = vmatprep.mubr.f32.mxu0 %v2728_v58  ;;  %v2453_v31 = vld [vmem:[#allocation11 + $0x90] ss:$8 sps:$4 sm:$0xff]  }
 0x1cb   :  { %1752 = vmatprep.subr.bf16.mxu0 %v2382_v33  ;;  %v2456_v33 = vld [vmem:[#allocation11 + $0xa0] ss:$8 sps:$4 sm:$0xff]  }
 0x1ce   :  { %1754 = vmatpush1.bf16.msra.mxu0 %v2384_v34  ;;  %v2457_v34 = vld [vmem:[#allocation11 + $0xb4] ss:$8 sps:$4 sm:$0xff]  }
 0x1cf   :  { %1756 = vmatprep.subr.bf16.mxu0 %v2388_v35  ;;  %v2459_v35 = vld [vmem:[#allocation11 + $0xb0] ss:$8 sps:$4 sm:$0xff]  }
 0x1d2   :  { %1758 = vmatpush1.bf16.msra.mxu0 %v2390_v36  ;;  %v2460_v36 = vld [vmem:[#allocation11 + $0xc4] ss:$8 sps:$4 sm:$0xff]  }
 0x1d3   :  { %1760 = vmatprep.subr.bf16.mxu0 %v2394_v37  ;;  %v2462_v37 = vld [vmem:[#allocation11 + $0xc0] ss:$8 sps:$4 sm:$0xff]  }
 0x1d6   :  { %1762 = vmatpush1.bf16.msra.mxu0 %v2396_v39  ;;  %v2465_v39 = vld [vmem:[#allocation11 + $0xd0] ss:$8 sps:$4 sm:$0xff]  }
 0x1d7   :  { %1764 = vmatprep.subr.bf16.mxu0 %v2400_v41  ;;  %v2468_v41 = vld [vmem:[#allocation11 + $0xe0] ss:$8 sps:$4 sm:$0xff]  }
 0x1da   :  { %1766 = vmatpush1.bf16.msra.mxu0 %v2402_v46  ;;  %v2471_v46 = vld [vmem:[#allocation11 + $0xf0] ss:$8 sps:$4 sm:$0xff]  }
 0x1db   :  { %1768 = vmatprep.subr.bf16.mxu0 %v2406_v48  ;;  %v2923_v48 = vld [vmem:[%s2974_s7] sm:$0xf]  ;;  %s2729_s7 = smov [#allocation14]  }
 0x1dc   :  { %v938_v50 = vrot.slane %v2923_v48, %v2901_v45  ;;  %v946_v51 = vrot.slane %v2923_v48, %v327_v61  ;;  %v2478_v61 = vld [vmem:[#allocation11 + $0x124] ss:$8 sps:$4 sm:$0xff]   ;;  %s1473_s13 = sshll.u32 %s2729_s7, 4  ;;  %s1474_s13 = int_to_ptr.vmem [resolvable:$true] %s1473_s13 }
 0x1dd   :  { %s2662_s15 = scalar_lea.vmem %s1474_s13, 256  ;;  %p2667_p7 = scmp.lt.s32.totalorder %s1474_s13, %s1474_s13 }
 0x1de   :  { %1770 = vmatpush1.bf16.msra.mxu0 %v2408_v49  ;;  %v934_v49 = vrot.slane %v2923_v48, %v2893_v43  ;;  %p2663_p6 = scmp.ne.s32.totalorder %s1474_s13, %s2662_s15  ;;  %p2668_p8 = scmp.lt.s32.totalorder %s2662_s15, %s2662_s15 }
 0x1df   :  { %1772 = vmatprep.subr.bf16.mxu0 %v2412_v52 }
 0x1e0   :  { %p2669_p9 = por %p2668_p8, %p2667_p7 }
 0x1e2   :  { %1774 = vmatpush1.bf16.msra.mxu0 %v2414_v54  ;;  %p2670_p10 = pnand %p2669_p9, %p2663_p6 }
 0x1e3   :  { %1776 = vmatprep.subr.bf16.mxu0 %v2418_v56 }
 0x1e6   :  { %1778 = vmatpush1.bf16.msra.mxu0 %v2420_v59 }
 0x29c   :  { %v820_v2 = vpop.f32.mrb[2].mxu0 }
 0x29d   :  { %v1939_v3 = vadd.f32 %v820_v2, %v676_v0  ;;  %v822_v4 = vpop.f32.mrb[3].mxu0  ;;  %v2480_v2 = vld [vmem:[#allocation11 + $0x120] ss:$8 sps:$4 sm:$0xff]  }
 0x29e   :  { %v1940_v5 = vadd.f32 %v822_v4, %v680_v1  ;;  %v2477_v1 = vld [vmem:[#allocation11 + $0x110] ss:$8 sps:$4 sm:$0xff]  }
 0x29f   :  { %825 = vst [vmem:[#allocation14] sm:$0xff] %v1939_v3  ;;  %v2483_v4 = vld [vmem:[#allocation11 + $0x130] ss:$8 sps:$4 sm:$0xff]  }
 0x2a0   :  { %826 = vst [vmem:[#allocation14 + $0x8] sm:$0xff] %v1940_v5  ;;  %v828_v6 = vmul.f32 0.5, %v1940_v5  ;;  %v2484_v5 = vld [vmem:[#allocation11 + $0x144] ss:$8 sps:$4 sm:$0xff]  }
 0x2a2   :  { %v829_v7 = vmul.f32 1.442695, %v828_v6  ;;  %v2486_v6 = vld [vmem:[#allocation11 + $0x140] ss:$8 sps:$4 sm:$0xff]  }
 0x2a4   :  { %2520 = vpow2.f32 %v829_v7  ;;  %v2487_v7 = vld [vmem:[#allocation11 + $0x154] ss:$8 sps:$4 sm:$0xff]  }
 0x2ae   :  { %v2521_v9 = vpop.eup %2520 }
 0x2af   :  { %v831_v10 = vmul.f32 %v2521_v9, %v827_v8  ;;  %v2489_v8 = vld [vmem:[#allocation11 + $0x150] ss:$8 sps:$4 sm:$0xff]   ;;  %v2490_v9 = vld [vmem:[#allocation11 + $0x164] ss:$8 sps:$4 sm:$0xff]  }
 0x2b1   :  { %v832_v12 = vadd.f32 %v1939_v3, %v831_v10  ;;  %v2481_v3 = vld [vmem:[#allocation11 + $0x134] ss:$8 sps:$4 sm:$0xff]   ;;  %v2492_v10 = vld [vmem:[#allocation11 + $0x160] ss:$8 sps:$4 sm:$0xff]  }
 0x2b3   :  { %1016 = vmatmul.mubr.f32.vlgmr.msra.gmra.mrb[4].mxu0 %v832_v12  ;;  %1087 = vmatmul.mubr.f32.vlgmr.msra.gmra.mrb[2].mxu1 %v832_v12  ;;  %v2495_v12 = vld [vmem:[#allocation11 + $0x170] ss:$8 sps:$4 sm:$0xff]  }
 0x2b4   :  { %1814 = vmatpush1.bf16.msra.mxu1 %v2426_v11  ;;  %v2493_v11 = vld [vmem:[#allocation11 + $0x174] ss:$8 sps:$4 sm:$0xff]  }
 0x2b5   :  { %1816 = vmatprep.subr.bf16.mxu1 %v2427_v13  ;;  %v2496_v13 = vld [vmem:[#allocation11 + $0x184] ss:$8 sps:$4 sm:$0xff]  }
 0x2b8   :  { %1818 = vmatpush1.bf16.msra.mxu1 %v2429_v14  ;;  %v2498_v14 = vld [vmem:[#allocation11 + $0x180] ss:$8 sps:$4 sm:$0xff]  }
 0x2b9   :  { %1820 = vmatprep.subr.bf16.mxu1 %v2430_v15  ;;  %v2499_v15 = vld [vmem:[#allocation11 + $0x194] ss:$8 sps:$4 sm:$0xff]  }
 0x2bc   :  { %1822 = vmatpush1.bf16.msra.mxu1 %v2432_v16  ;;  %v2501_v16 = vld [vmem:[#allocation11 + $0x190] ss:$8 sps:$4 sm:$0xff]  }
 0x2bd   :  { %1824 = vmatprep.subr.bf16.mxu1 %v2433_v17  ;;  %v2502_v17 = vld [vmem:[#allocation11 + $0x1a4] ss:$8 sps:$4 sm:$0xff]  }
 0x2c0   :  { %1826 = vmatpush1.bf16.msra.mxu1 %v2435_v18  ;;  %v2504_v18 = vld [vmem:[#allocation11 + $0x1a0] ss:$8 sps:$4 sm:$0xff]  }
 0x2c1   :  { %1828 = vmatprep.subr.bf16.mxu1 %v2436_v19  ;;  %v2505_v19 = vld [vmem:[#allocation11 + $0x1b4] ss:$8 sps:$4 sm:$0xff]  }
 0x2c4   :  { %1830 = vmatpush1.bf16.msra.mxu1 %v2438_v20  ;;  %v2507_v20 = vld [vmem:[#allocation11 + $0x1b0] ss:$8 sps:$4 sm:$0xff]  }
 0x2c5   :  { %1832 = vmatprep.subr.bf16.mxu1 %v2439_v21  ;;  %v2508_v21 = vld [vmem:[#allocation11 + $0x1c4] ss:$8 sps:$4 sm:$0xff]  }
 0x2c8   :  { %1834 = vmatpush1.bf16.msra.mxu1 %v2441_v22  ;;  %v2510_v22 = vld [vmem:[#allocation11 + $0x1c0] ss:$8 sps:$4 sm:$0xff]  }
 0x2c9   :  { %1836 = vmatprep.subr.bf16.mxu1 %v2442_v24  ;;  %v2511_v24 = vld [vmem:[#allocation11 + $0x1d4] ss:$8 sps:$4 sm:$0xff]  }
 0x2cc   :  { %1838 = vmatpush1.bf16.msra.mxu1 %v2444_v25  ;;  %v2513_v25 = vld [vmem:[#allocation11 + $0x1d0] ss:$8 sps:$4 sm:$0xff]  }
 0x2cd   :  { %1840 = vmatprep.subr.bf16.mxu1 %v2445_v26  ;;  %v2514_v26 = vld [vmem:[#allocation11 + $0x1e4] ss:$8 sps:$4 sm:$0xff]  }
 0x2d0   :  { %1842 = vmatpush1.bf16.msra.mxu1 %v2447_v27  ;;  %v2516_v27 = vld [vmem:[#allocation11 + $0x1e0] ss:$8 sps:$4 sm:$0xff]  }
 0x2d1   :  { %1844 = vmatprep.subr.bf16.mxu1 %v2448_v28  ;;  %v942_v28 = vrot.slane %v2923_v48, %v323_v23 }
 0x2d4   :  { %1846 = vmatpush1.bf16.msra.mxu1 %v2450_v29  ;;  %v2517_v29 = vld [vmem:[#allocation11 + $0x1f4] ss:$8 sps:$4 sm:$0xff]  }
 0x2d5   :  { %1848 = vmatprep.subr.bf16.mxu1 %v2451_v30  ;;  %v2519_v30 = vld [vmem:[#allocation11 + $0x1f0] ss:$8 sps:$4 sm:$0xff]  }
 0x2d8   :  { %1850 = vmatpush1.bf16.msra.mxu1 %v2453_v31 }
 0x2d9   :  { %1852 = vmatprep.subr.bf16.mxu1 %v2454_v32 }
 0x2dc   :  { %1854 = vmatpush1.bf16.msra.mxu1 %v2456_v33 }
 0x2dd   :  { %1856 = vmatprep.subr.bf16.mxu1 %v2457_v34 }
 0x2e0   :  { %1858 = vmatpush1.bf16.msra.mxu1 %v2459_v35 }
 0x2e1   :  { %1860 = vmatprep.subr.bf16.mxu1 %v2460_v36 }
 0x2e4   :  { %1862 = vmatpush1.bf16.msra.mxu1 %v2462_v37 }
 0x2e5   :  { %1864 = vmatprep.subr.bf16.mxu1 %v2463_v38 }
 0x2e8   :  { %1866 = vmatpush1.bf16.msra.mxu1 %v2465_v39 }
 0x2e9   :  { %1868 = vmatprep.subr.bf16.mxu1 %v2466_v40 }
 0x2ec   :  { %1870 = vmatpush1.bf16.msra.mxu1 %v2468_v41 }
 0x2ed   :  { %1872 = vmatprep.subr.bf16.mxu1 %v2469_v44 }
 0x2f0   :  { %1874 = vmatpush1.bf16.msra.mxu1 %v2471_v46 }
 0x2f1   :  { %1876 = vmatprep.subr.bf16.mxu1 %v2472_v47 }
 0x386   :  { %v1017_v52 = vpop.f32.mrb[4].mxu0  ;;  %v2932_v53 = vpop.f32.mrb[2].mxu1 }
 0x387   :  { %v1018_v54 = vadd.f32 %v1017_v52, %v934_v49  ;;  %v1019_v55 = vpop.f32.mrb[5].mxu0  ;;  %v1090_v56 = vpop.f32.mrb[3].mxu1  ;;  %v1089_v31 = vadd.f32 %v2932_v53, %v942_v28 }
 0x388   :  { %v1020_v57 = vadd.f32 %v1019_v55, %v938_v50  ;;  %v1091_v58 = vadd.f32 %v1090_v56, %v946_v51 }
 0x389   :  { %v1093_v62 = vmax.f32 %v1018_v54, 0.0  ;;  %v1095_v32 = vmax.f32 %v1089_v31, 0.0 }
 0x38a   :  { %v1094_v59 = vmax.f32 %v1020_v57, 0.0  ;;  %v1096_v0 = vmax.f32 %v1091_v58, 0.0 }
 0x38c   :  { %1365 = vmatprep.mubr.f32.mxu1 %v1094_v59 }
 0x38d   :  { %1366 = vmatmul.mubr.f32.vlgmr.msra.gmra.mrb[4].mxu1 %v1093_v62 }
 0x38e   :  { %1878 = vmatpush1.bf16.msra.mxu1 %v2474_v60  ;;  %1436 = vmatprep.mubr.f32.mxu1 %v1096_v0 }
 0x38f   :  { %1880 = vmatprep.subr.bf16.mxu1 %v2475_v63 }
 0x392   :  { %1882 = vmatpush1.bf16.msra.mxu1 %v2477_v1 }
 0x393   :  { %1884 = vmatprep.subr.bf16.mxu1 %v2478_v61 }
 0x396   :  { %1886 = vmatpush1.bf16.msra.mxu1 %v2480_v2 }
 0x397   :  { %1888 = vmatprep.subr.bf16.mxu1 %v2481_v3 }
 0x39a   :  { %1890 = vmatpush1.bf16.msra.mxu1 %v2483_v4 }
 0x39b   :  { %1892 = vmatprep.subr.bf16.mxu1 %v2484_v5 }
 0x39e   :  { %1894 = vmatpush1.bf16.msra.mxu1 %v2486_v6 }
 0x39f   :  { %1896 = vmatprep.subr.bf16.mxu1 %v2487_v7 }
 0x3a2   :  { %1898 = vmatpush1.bf16.msra.mxu1 %v2489_v8 }
 0x3a3   :  { %1900 = vmatprep.subr.bf16.mxu1 %v2490_v9 }
 0x3a6   :  { %1902 = vmatpush1.bf16.msra.mxu1 %v2492_v10 }
 0x3a7   :  { %1904 = vmatprep.subr.bf16.mxu1 %v2493_v11 }
 0x3aa   :  { %1906 = vmatpush1.bf16.msra.mxu1 %v2495_v12 }
 0x3ab   :  { %1908 = vmatprep.subr.bf16.mxu1 %v2496_v13 }
 0x3ae   :  { %1910 = vmatpush1.bf16.msra.mxu1 %v2498_v14 }
 0x3af   :  { %1912 = vmatprep.subr.bf16.mxu1 %v2499_v15 }
 0x3b2   :  { %1914 = vmatpush1.bf16.msra.mxu1 %v2501_v16 }
 0x3b3   :  { %1916 = vmatprep.subr.bf16.mxu1 %v2502_v17 }
 0x3b6   :  { %1918 = vmatpush1.bf16.msra.mxu1 %v2504_v18 }
 0x3b7   :  { %1920 = vmatprep.subr.bf16.mxu1 %v2505_v19 }
 0x3ba   :  { %1922 = vmatpush1.bf16.msra.mxu1 %v2507_v20 }
 0x3bb   :  { %1924 = vmatprep.subr.bf16.mxu1 %v2508_v21 }
 0x3be   :  { %1926 = vmatpush1.bf16.msra.mxu1 %v2510_v22 }
 0x3bf   :  { %1928 = vmatprep.subr.bf16.mxu1 %v2511_v24 }
 0x3c2   :  { %1930 = vmatpush1.bf16.msra.mxu1 %v2513_v25 }
 0x3c3   :  { %1932 = vmatprep.subr.bf16.mxu1 %v2514_v26 }
 0x3c6   :  { %1934 = vmatpush1.bf16.msra.mxu1 %v2516_v27 }
 0x3c7   :  { %1936 = vmatprep.subr.bf16.mxu1 %v2517_v29 }
 0x3ca   :  { %1938 = vmatpush1.bf16.msra.mxu1 %v2519_v30 }
 0x3cd   :  { %1437 = vmatmul.mubr.f32.vlgmr.msra.gmra.mrb[4].mxu1 %v1095_v32 }
 0x3ce   :  { %2673 = shalt.err (!%p2670_p10)
}
 0x3cf   :  { %s2674_s17 = scalar_lea.hbm %s2978_s11, 256 }
 0x3d0   :  { %p2675_p11 = scmp.ne.s32.totalorder %s2978_s11, %s2674_s17  ;;  %p2678_p12 = scmp.lt.u32.totalorder %s2674_s17, %s2978_s11 }
 0x3d2   :  { %p2680_p13 = pnand %p2678_p12, %p2675_p11 }
 0x3d4   :  { %2683 = shalt.err (!%p2680_p13)
}
 0x3d5   :  { %1476 = dma.vmem_to_hbm [thread:$0]  %s1474_s13, 256, %s2978_s11, [#allocation15]   ;;  %v1289_v42 = vld [vmem:[%s2976_s9] sm:$0x3] }
 0x3d6   :  { %v1294_v23 = vrot.slane %v1289_v42, %v2893_v43  ;;  %v1298_v33 = vrot.slane %v1289_v42, %v2901_v45  ;;  %s2730_s11 = smov [#allocation13]  }
 0x3d7   :  { %s1463_s9 = sshll.u32 %s2730_s11, 4  ;;  %s1464_s9 = int_to_ptr.vmem [resolvable:$true] %s1463_s9 }
 0x3d8   :  { %s2684_s28 = scalar_lea.vmem %s1464_s9, 256  ;;  %p2689_p1 = scmp.lt.s32.totalorder %s1464_s9, %s1464_s9 }
 0x3d9   :  { %p2685_p0 = scmp.ne.s32.totalorder %s1464_s9, %s2684_s28  ;;  %p2690_p2 = scmp.lt.s32.totalorder %s2684_s28, %s2684_s28 }
 0x3db   :  { %p2691_p3 = por %p2690_p2, %p2689_p1 }
 0x3dd   :  { %p2692_p4 = pnand %p2691_p3, %p2685_p0 }
 0x4a0   :  { %v1438_v34 = vpop.f32.mrb[4].mxu1 }
 0x4a1   :  { %v1941_v35 = vadd.f32 %v1438_v34, %v1294_v23  ;;  %v1440_v36 = vpop.f32.mrb[5].mxu1 }
 0x4a2   :  { %v1942_v37 = vadd.f32 %v1440_v36, %v1298_v33 }
 0x4a3   :  { %v1489_v38 = vmul.f32 -1.442695, %v1941_v35 }
 0x4a4   :  { %v1490_v39 = vmul.f32 -1.442695, %v1942_v37 }
 0x4a5   :  { %2522 = vpow2.f32 %v1489_v38 }
 0x4a6   :  { %2524 = vpow2.f32 %v1490_v39 }
 0x4af   :  { %v2523_v40 = vpop.eup %2522 }
 0x4b0   :  { %v2525_v41 = vpop.eup %2524  ;;  %v1449_v44 = vadd.f32 1.0, %v2523_v40 }
 0x4b1   :  { %v1450_v46 = vadd.f32 1.0, %v2525_v41 }
 0x4b2   :  { %2526 = vrcp.f32 %v1449_v44 }
 0x4b3   :  { %2528 = vrcp.f32 %v1450_v46 }
 0x4bc   :  { %v2527_v47 = vpop.eup %2526 }
 0x4bd   :  { %v2529_v43 = vpop.eup %2528  ;;  %1455 = vst [vmem:[#allocation13] sm:$0xff] %v2527_v47 }
 0x4be   :  { %1456 = vst [vmem:[#allocation13 + $0x8] sm:$0xff] %v2529_v43 }
 0x4bf   :  { %2695 = shalt.err (!%p2692_p4)
}
 0x4c0   :  { %s2696_s12 = scalar_lea.hbm %s2977_s10, 256 }
 0x4c1   :  { %p2697_p5 = scmp.ne.s32.totalorder %s2977_s10, %s2696_s12  ;;  %p2700_p6 = scmp.lt.u32.totalorder %s2696_s12, %s2977_s10 }
 0x4c3   :  { %p2702_p7 = pnand %p2700_p6, %p2697_p5 }
 0x4c5   :  { %2705 = shalt.err (!%p2702_p7)
}
 0x4c6   :  { %1466 = dma.vmem_to_hbm [thread:$0]  %s1464_s9, 256, %s2977_s10, [#allocation4]  }
 0x4c7   :  { %2714 = dma.done.wait [#allocation4], 256  }
 0x4c8   :  { %2715 = vsyncadd [#allocation4], 4294967040 }
 0x4c9   :  { %2716 = dma.done.wait [#allocation15], 256  }
 0x4ca   :  { %2717 = vsyncadd [#allocation15], 4294967040 }
 0x4cb   :  { %1483 = vsyncpa [#allocation3], 1 }
 0x4cc   :  { %1484 = vsyncpa [#allocation6], 1 }
 0x4cd   :  { %1485 = vsyncpa [#allocation9], 1 }
 0x4ce   :  { %1486 = vsyncpa [#allocation12], 1 }
 0x4cf   :  { %1487 = vsyncpa [#allocation4], 1 }
 0x4d0   :  { %1488 = vsyncpa [#allocation15], 1 }

</bundles_post_ra>
